<compile_context>
chip_gen: v5e
topology: v5e:2x2
jax: 0.10.0
libtpu: 0.0.40
codegen_flags: <defaults>
</compile_context>

<pallas_src>
import functools

import jax
import jax.numpy as jnp
import numpy as np
from jax.experimental import pallas as pl
from jax.experimental.pallas import tpu as pltpu


def lstm_fc_kernel(x_ref, wih0_ref, wih_ref, whh_ref, b_ref, fcw_ref, fcb_ref,
                   out_ref, *, num_layers, seq_len, hidden, batch):
    """Whole-model kernel: multi-layer LSTM (wavefront schedule) + final Linear.

    x_ref    : (T*B, F)             layer-0 input, time-major flattened, bf16
    wih0_ref : (F, 4H)              layer-0 input->gate weights (transposed, [i,f,o,g]), bf16
    wih_ref  : (max(L-1,1), H, 4H)  layers>=1 input->gate weights, bf16
    whh_ref  : (L, H, 4H)           hidden->gate weights (transposed, [i,f,o,g]), bf16
    b_ref    : (L, 1, 4H)           b_ih + b_hh (packed [i,f,o,g]), f32
    fcw_ref  : (H, C)               final Linear weight (transposed), bf16
    fcb_ref  : (1, C)               final Linear bias, f32
    out_ref  : (B, C)               f32
    """
    B, T, H, L = batch, seq_len, hidden, num_layers
    bf16 = jnp.bfloat16

    # Load weights/biases once; reused across the fully-unrolled wavefront.
    whh_w = [whh_ref[l] for l in range(L)]                 # each (H, 4H) bf16
    wih_w = [wih_ref[l - 1] for l in range(1, L)]          # each (H, 4H) bf16
    bias = [b_ref[l] for l in range(L)]                    # each (1, 4H) f32

    # Hoisted layer-0 input projection for all timesteps, bias folded in.
    xg0 = jnp.dot(x_ref[...], wih0_ref[...],
                  preferred_element_type=jnp.float32) + bias[0]       # (T*B, 4H) f32

    def cell(gates, c):
        # Gate packing [i, f, o, g]: one sigmoid over 3H lanes, one tanh over H.
        sig = jax.nn.sigmoid(gates[:, :3 * H])
        g = jnp.tanh(gates[:, 3 * H:])
        i = sig[:, 0 * H:1 * H]
        f = sig[:, 1 * H:2 * H]
        o = sig[:, 2 * H:3 * H]
        c_new = f * c + i * g
        h_new = o * jnp.tanh(c_new)
        return h_new, c_new

    h = [jnp.zeros((B, H), jnp.float32) for _ in range(L)]
    c = [jnp.zeros((B, H), jnp.float32) for _ in range(L)]

    # Wavefront: step s computes (layer l, timestep t = s - l) for all valid l.
    # Every active cell reads only results of step s-1, so the matmuls of all
    # layers in a step are independent and overlap; serial chain = T + L - 1.
    for s in range(T + L - 1):
        h_prev = list(h)                                   # snapshot of step s-1
        for l in range(L):
            t = s - l
            if t < 0 or t >= T:
                continue
            rec = jnp.dot(h_prev[l].astype(bf16), whh_w[l],
                          preferred_element_type=jnp.float32)
            if l == 0:
                gates = xg0[t * B:(t + 1) * B, :] + rec
            else:
                gates = (jnp.dot(h_prev[l - 1].astype(bf16), wih_w[l - 1],
                                 preferred_element_type=jnp.float32)
                         + rec + bias[l])
            h[l], c[l] = cell(gates, c[l])

    # Final Linear on the last timestep of the top layer.
    out_ref[...] = (jnp.dot(h[L - 1].astype(bf16), fcw_ref[...],
                            preferred_element_type=jnp.float32) + fcb_ref[...])


def lstm_model_forward(x, params, *, hidden, num_layers, num_classes):
    """Wrapper: time-major flatten of x, single grid-less all-VMEM pallas_call."""
    B, T, F = x.shape
    # (B, T, F) -> (T*B, F): rows [t0 all b, t1 all b, ...] so per-step slices are
    # contiguous static slices inside the kernel (no in-kernel gather/reshape).
    xt = jnp.transpose(x, (1, 0, 2)).reshape(T * B, F).astype(jnp.bfloat16)

    kernel = functools.partial(lstm_fc_kernel, num_layers=num_layers,
                               seq_len=T, hidden=hidden, batch=B)
    return pl.pallas_call(
        kernel,
        out_shape=jax.ShapeDtypeStruct((B, num_classes), jnp.float32),
        in_specs=[pl.BlockSpec(memory_space=pltpu.MemorySpace.VMEM)] * 7,
        out_specs=pl.BlockSpec(memory_space=pltpu.MemorySpace.VMEM),
    )(xt, params["wih0"], params["wih"], params["whh"],
      params["b"], params["fcw"], params["fcb"])


def init_params(key, *, input_size, hidden, num_layers, num_classes):
    """PyTorch-style init U(-1/sqrt(H), 1/sqrt(H)); gates repacked [i,f,o,g], bf16 weights."""
    H = hidden
    k = 1.0 / np.sqrt(H)
    keys = jax.random.split(key, 4 * num_layers + 2)

    def pack(w):
        # w: (4H, in_dim) in PyTorch gate order [i, f, g, o] -> ours [i, f, o, g], transposed.
        i, f, g, o = jnp.split(w, 4, axis=0)
        return jnp.concatenate([i, f, o, g], axis=0).T        # (in_dim, 4H)

    wih_list, whh_list, b_list = [], [], []
    for l in range(num_layers):
        in_dim = input_size if l == 0 else H
        w_ih = jax.random.uniform(keys[4 * l + 0], (4 * H, in_dim), jnp.float32, -k, k)
        w_hh = jax.random.uniform(keys[4 * l + 1], (4 * H, H), jnp.float32, -k, k)
        b_ih = jax.random.uniform(keys[4 * l + 2], (4 * H,), jnp.float32, -k, k)
        b_hh = jax.random.uniform(keys[4 * l + 3], (4 * H,), jnp.float32, -k, k)
        wih_list.append(pack(w_ih))                           # (in_dim, 4H)
        whh_list.append(pack(w_hh))                           # (H, 4H)
        b_list.append(pack((b_ih + b_hh)[:, None]))           # (1, 4H)

    wih0 = wih_list[0].astype(jnp.bfloat16)                   # (F, 4H) -- real input dim, no padding
    if num_layers > 1:
        wih = jnp.stack(wih_list[1:], axis=0).astype(jnp.bfloat16)   # (L-1, H, 4H)
    else:
        wih = jnp.zeros((1, H, 4 * H), jnp.bfloat16)          # dummy, never indexed
    whh = jnp.stack(whh_list, axis=0).astype(jnp.bfloat16)    # (L, H, 4H)
    b = jnp.stack(b_list, axis=0)                             # (L, 1, 4H) f32

    fc_w = jax.random.uniform(keys[-2], (num_classes, H), jnp.float32, -k, k)
    fc_b = jax.random.uniform(keys[-1], (num_classes,), jnp.float32, -k, k)

    return {"wih0": wih0, "wih": wih, "whh": whh, "b": b,
            "fcw": fc_w.T.astype(jnp.bfloat16), "fcb": fc_b[None, :]}


def reference_forward(x, params, *, hidden, num_layers, num_classes):
    """Plain-JAX sequential reference with identical math (bf16 operands, f32 accumulate)."""
    B, T, F = x.shape
    H = hidden
    bf16 = jnp.bfloat16
    seq = jnp.transpose(x, (1, 0, 2)).reshape(T * B, F).astype(bf16)   # (T*B, F)
    h = None
    for l in range(num_layers):
        w_in = params["wih0"] if l == 0 else params["wih"][l - 1]
        xg = jnp.dot(seq, w_in, preferred_element_type=jnp.float32) + params["b"][l]
        whh = params["whh"][l]
        h = jnp.zeros((B, H), jnp.float32)
        c = jnp.zeros((B, H), jnp.float32)
        outs = []
        for t in range(T):
            gates = xg[t * B:(t + 1) * B, :] + jnp.dot(
                h.astype(bf16), whh, preferred_element_type=jnp.float32)
            sig = jax.nn.sigmoid(gates[:, :3 * H])
            g = jnp.tanh(gates[:, 3 * H:])
            i, f, o = sig[:, :H], sig[:, H:2 * H], sig[:, 2 * H:3 * H]
            c = f * c + i * g
            h = o * jnp.tanh(c)
            outs.append(h)
        seq = jnp.concatenate(outs, axis=0).astype(bf16)               # input to next layer
    return (jnp.dot(h.astype(bf16), params["fcw"],
                    preferred_element_type=jnp.float32) + params["fcb"])


if __name__ == "__main__":
    BATCH, SEQ, INPUT_SIZE = 2, 8, 16
    HIDDEN, NUM_LAYERS, NUM_CLASSES = 64, 2, 5   # hidden must be 64 to match Linear(64, C)

    key = jax.random.PRNGKey(0)
    k_x, k_p = jax.random.split(key)
    x = jax.random.normal(k_x, (BATCH, SEQ, INPUT_SIZE), jnp.float32)
    params = init_params(k_p, input_size=INPUT_SIZE, hidden=HIDDEN,
                         num_layers=NUM_LAYERS, num_classes=NUM_CLASSES)

    out = lstm_model_forward(x, params, hidden=HIDDEN,
                             num_layers=NUM_LAYERS, num_classes=NUM_CLASSES)
    out = jax.block_until_ready(out)

    ref = reference_forward(x, params, hidden=HIDDEN,
                            num_layers=NUM_LAYERS, num_classes=NUM_CLASSES)
    np.testing.assert_allclose(np.asarray(out), np.asarray(ref), rtol=1e-2, atol=1e-2)

    print("KERNEL_OK")
</pallas_src>

<mosaic_0001>
module attributes {stable_mosaic.version = 11 : i64} {
  func.func @lstm_fc_kernel(%arg0: memref<16x16xbf16, #tpu.memory_space<vmem>>, %arg1: memref<16x256xbf16, #tpu.memory_space<vmem>>, %arg2: memref<1x64x256xbf16, #tpu.memory_space<vmem>>, %arg3: memref<2x64x256xbf16, #tpu.memory_space<vmem>>, %arg4: memref<2x1x256xf32, #tpu.memory_space<vmem>>, %arg5: memref<64x5xbf16, #tpu.memory_space<vmem>>, %arg6: memref<1x5xf32, #tpu.memory_space<vmem>>, %arg7: memref<2x5xf32, #tpu.memory_space<vmem>>) attributes {dimension_semantics = [], scalar_prefetch = 0 : i64, scratch_operands = 0 : i64, tpu.core_type = #tpu.core_type<tc>} {
    %c0 = arith.constant 0 : index
    %c0_0 = arith.constant 0 : index
    %c0_1 = arith.constant 0 : index
    %0 = vector.load %arg3[%c0, %c0_0, %c0_1] : memref<2x64x256xbf16, #tpu.memory_space<vmem>>, vector<1x64x256xbf16>
    %1 = vector.shape_cast %0 : vector<1x64x256xbf16> to vector<64x256xbf16>
    %c1 = arith.constant 1 : index
    %c0_2 = arith.constant 0 : index
    %c0_3 = arith.constant 0 : index
    %2 = vector.load %arg3[%c1, %c0_2, %c0_3] : memref<2x64x256xbf16, #tpu.memory_space<vmem>>, vector<1x64x256xbf16>
    %3 = vector.shape_cast %2 : vector<1x64x256xbf16> to vector<64x256xbf16>
    %c0_4 = arith.constant 0 : index
    %c0_5 = arith.constant 0 : index
    %c0_6 = arith.constant 0 : index
    %4 = vector.load %arg2[%c0_4, %c0_5, %c0_6] : memref<1x64x256xbf16, #tpu.memory_space<vmem>>, vector<1x64x256xbf16>
    %5 = vector.shape_cast %4 : vector<1x64x256xbf16> to vector<64x256xbf16>
    %c0_7 = arith.constant 0 : index
    %c0_8 = arith.constant 0 : index
    %c0_9 = arith.constant 0 : index
    %6 = vector.load %arg4[%c0_7, %c0_8, %c0_9] : memref<2x1x256xf32, #tpu.memory_space<vmem>>, vector<1x1x256xf32>
    %7 = vector.shape_cast %6 : vector<1x1x256xf32> to vector<1x256xf32>
    %c1_10 = arith.constant 1 : index
    %c0_11 = arith.constant 0 : index
    %c0_12 = arith.constant 0 : index
    %8 = vector.load %arg4[%c1_10, %c0_11, %c0_12] : memref<2x1x256xf32, #tpu.memory_space<vmem>>, vector<1x1x256xf32>
    %9 = vector.shape_cast %8 : vector<1x1x256xf32> to vector<1x256xf32>
    %c0_13 = arith.constant 0 : index
    %c0_14 = arith.constant 0 : index
    %10 = vector.load %arg0[%c0_13, %c0_14] : memref<16x16xbf16, #tpu.memory_space<vmem>>, vector<16x16xbf16>
    %c0_15 = arith.constant 0 : index
    %c0_16 = arith.constant 0 : index
    %11 = vector.load %arg1[%c0_15, %c0_16] : memref<16x256xbf16, #tpu.memory_space<vmem>>, vector<16x256xbf16>
    %cst = arith.constant dense<0.000000e+00> : vector<16x256xf32>
    %12 = tpu.matmul %10, %11, %cst {dimension_numbers = #tpu.dot_dimension_numbers<[1], [0], [0], [1], [0, 0, 1, 1], [], []>} : vector<16x16xbf16>, vector<16x256xbf16>, vector<16x256xf32> -> vector<16x256xf32>
    %13 = vector.broadcast %7 : vector<1x256xf32> to vector<16x256xf32>
    %14 = arith.addf %12, %13 : vector<16x256xf32>
    %cst_17 = arith.constant 0.000000e+00 : f32
    %15 = vector.broadcast %cst_17 : f32 to vector<2x64xf32>
    %cst_18 = arith.constant 0.000000e+00 : f32
    %16 = vector.broadcast %cst_18 : f32 to vector<2x64xf32>
    %cst_19 = arith.constant 0.000000e+00 : f32
    %17 = vector.broadcast %cst_19 : f32 to vector<2x64xf32>
    %cst_20 = arith.constant 0.000000e+00 : f32
    %18 = vector.broadcast %cst_20 : f32 to vector<2x64xf32>
    %19 = arith.truncf %15 : vector<2x64xf32> to vector<2x64xbf16>
    %cst_21 = arith.constant dense<0.000000e+00> : vector<2x256xf32>
    %20 = tpu.matmul %19, %1, %cst_21 {dimension_numbers = #tpu.dot_dimension_numbers<[1], [0], [0], [1], [0, 0, 1, 1], [], []>} : vector<2x64xbf16>, vector<64x256xbf16>, vector<2x256xf32> -> vector<2x256xf32>
    %21 = vector.extract_strided_slice %14 {offsets = [0, 0], sizes = [2, 256], strides = [1, 1]} : vector<16x256xf32> to vector<2x256xf32>
    %22 = arith.addf %21, %20 : vector<2x256xf32>
    %23 = vector.extract_strided_slice %22 {offsets = [0, 0], sizes = [2, 192], strides = [1, 1]} : vector<2x256xf32> to vector<2x192xf32>
    %24 = arith.negf %23 : vector<2x192xf32>
    %25 = math.exp %24 : vector<2x192xf32>
    %cst_22 = arith.constant 1.000000e+00 : f32
    %26 = vector.broadcast %cst_22 : f32 to vector<2x192xf32>
    %27 = arith.addf %26, %25 : vector<2x192xf32>
    %28 = arith.divf %26, %27 : vector<2x192xf32>
    %29 = vector.extract_strided_slice %22 {offsets = [0, 192], sizes = [2, 64], strides = [1, 1]} : vector<2x256xf32> to vector<2x64xf32>
    %30 = math.tanh %29 : vector<2x64xf32>
    %31 = vector.extract_strided_slice %28 {offsets = [0, 0], sizes = [2, 64], strides = [1, 1]} : vector<2x192xf32> to vector<2x64xf32>
    %32 = vector.extract_strided_slice %28 {offsets = [0, 64], sizes = [2, 64], strides = [1, 1]} : vector<2x192xf32> to vector<2x64xf32>
    %33 = vector.extract_strided_slice %28 {offsets = [0, 128], sizes = [2, 64], strides = [1, 1]} : vector<2x192xf32> to vector<2x64xf32>
    %34 = arith.mulf %32, %17 : vector<2x64xf32>
    %35 = arith.mulf %31, %30 : vector<2x64xf32>
    %36 = arith.addf %34, %35 : vector<2x64xf32>
    %37 = math.tanh %36 : vector<2x64xf32>
    %38 = arith.mulf %33, %37 : vector<2x64xf32>
    %39 = arith.truncf %38 : vector<2x64xf32> to vector<2x64xbf16>
    %cst_23 = arith.constant dense<0.000000e+00> : vector<2x256xf32>
    %40 = tpu.matmul %39, %1, %cst_23 {dimension_numbers = #tpu.dot_dimension_numbers<[1], [0], [0], [1], [0, 0, 1, 1], [], []>} : vector<2x64xbf16>, vector<64x256xbf16>, vector<2x256xf32> -> vector<2x256xf32>
    %41 = vector.extract_strided_slice %14 {offsets = [2, 0], sizes = [2, 256], strides = [1, 1]} : vector<16x256xf32> to vector<2x256xf32>
    %42 = arith.addf %41, %40 : vector<2x256xf32>
    %43 = vector.extract_strided_slice %42 {offsets = [0, 0], sizes = [2, 192], strides = [1, 1]} : vector<2x256xf32> to vector<2x192xf32>
    %44 = arith.negf %43 : vector<2x192xf32>
    %45 = math.exp %44 : vector<2x192xf32>
    %cst_24 = arith.constant 1.000000e+00 : f32
    %46 = vector.broadcast %cst_24 : f32 to vector<2x192xf32>
    %47 = arith.addf %46, %45 : vector<2x192xf32>
    %48 = arith.divf %46, %47 : vector<2x192xf32>
    %49 = vector.extract_strided_slice %42 {offsets = [0, 192], sizes = [2, 64], strides = [1, 1]} : vector<2x256xf32> to vector<2x64xf32>
    %50 = math.tanh %49 : vector<2x64xf32>
    %51 = vector.extract_strided_slice %48 {offsets = [0, 0], sizes = [2, 64], strides = [1, 1]} : vector<2x192xf32> to vector<2x64xf32>
    %52 = vector.extract_strided_slice %48 {offsets = [0, 64], sizes = [2, 64], strides = [1, 1]} : vector<2x192xf32> to vector<2x64xf32>
    %53 = vector.extract_strided_slice %48 {offsets = [0, 128], sizes = [2, 64], strides = [1, 1]} : vector<2x192xf32> to vector<2x64xf32>
    %54 = arith.mulf %52, %36 : vector<2x64xf32>
    %55 = arith.mulf %51, %50 : vector<2x64xf32>
    %56 = arith.addf %54, %55 : vector<2x64xf32>
    %57 = math.tanh %56 : vector<2x64xf32>
    %58 = arith.mulf %53, %57 : vector<2x64xf32>
    %59 = arith.truncf %16 : vector<2x64xf32> to vector<2x64xbf16>
    %cst_25 = arith.constant dense<0.000000e+00> : vector<2x256xf32>
    %60 = tpu.matmul %59, %3, %cst_25 {dimension_numbers = #tpu.dot_dimension_numbers<[1], [0], [0], [1], [0, 0, 1, 1], [], []>} : vector<2x64xbf16>, vector<64x256xbf16>, vector<2x256xf32> -> vector<2x256xf32>
    %61 = arith.truncf %38 : vector<2x64xf32> to vector<2x64xbf16>
    %cst_26 = arith.constant dense<0.000000e+00> : vector<2x256xf32>
    %62 = tpu.matmul %61, %5, %cst_26 {dimension_numbers = #tpu.dot_dimension_numbers<[1], [0], [0], [1], [0, 0, 1, 1], [], []>} : vector<2x64xbf16>, vector<64x256xbf16>, vector<2x256xf32> -> vector<2x256xf32>
    %63 = arith.addf %62, %60 : vector<2x256xf32>
    %64 = vector.broadcast %9 : vector<1x256xf32> to vector<2x256xf32>
    %65 = arith.addf %63, %64 : vector<2x256xf32>
    %66 = vector.extract_strided_slice %65 {offsets = [0, 0], sizes = [2, 192], strides = [1, 1]} : vector<2x256xf32> to vector<2x192xf32>
    %67 = arith.negf %66 : vector<2x192xf32>
    %68 = math.exp %67 : vector<2x192xf32>
    %cst_27 = arith.constant 1.000000e+00 : f32
    %69 = vector.broadcast %cst_27 : f32 to vector<2x192xf32>
    %70 = arith.addf %69, %68 : vector<2x192xf32>
    %71 = arith.divf %69, %70 : vector<2x192xf32>
    %72 = vector.extract_strided_slice %65 {offsets = [0, 192], sizes = [2, 64], strides = [1, 1]} : vector<2x256xf32> to vector<2x64xf32>
    %73 = math.tanh %72 : vector<2x64xf32>
    %74 = vector.extract_strided_slice %71 {offsets = [0, 0], sizes = [2, 64], strides = [1, 1]} : vector<2x192xf32> to vector<2x64xf32>
    %75 = vector.extract_strided_slice %71 {offsets = [0, 64], sizes = [2, 64], strides = [1, 1]} : vector<2x192xf32> to vector<2x64xf32>
    %76 = vector.extract_strided_slice %71 {offsets = [0, 128], sizes = [2, 64], strides = [1, 1]} : vector<2x192xf32> to vector<2x64xf32>
    %77 = arith.mulf %75, %18 : vector<2x64xf32>
    %78 = arith.mulf %74, %73 : vector<2x64xf32>
    %79 = arith.addf %77, %78 : vector<2x64xf32>
    %80 = math.tanh %79 : vector<2x64xf32>
    %81 = arith.mulf %76, %80 : vector<2x64xf32>
    %82 = arith.truncf %58 : vector<2x64xf32> to vector<2x64xbf16>
    %cst_28 = arith.constant dense<0.000000e+00> : vector<2x256xf32>
    %83 = tpu.matmul %82, %1, %cst_28 {dimension_numbers = #tpu.dot_dimension_numbers<[1], [0], [0], [1], [0, 0, 1, 1], [], []>} : vector<2x64xbf16>, vector<64x256xbf16>, vector<2x256xf32> -> vector<2x256xf32>
    %84 = vector.extract_strided_slice %14 {offsets = [4, 0], sizes = [2, 256], strides = [1, 1]} : vector<16x256xf32> to vector<2x256xf32>
    %85 = arith.addf %84, %83 : vector<2x256xf32>
    %86 = vector.extract_strided_slice %85 {offsets = [0, 0], sizes = [2, 192], strides = [1, 1]} : vector<2x256xf32> to vector<2x192xf32>
    %87 = arith.negf %86 : vector<2x192xf32>
    %88 = math.exp %87 : vector<2x192xf32>
    %cst_29 = arith.constant 1.000000e+00 : f32
    %89 = vector.broadcast %cst_29 : f32 to vector<2x192xf32>
    %90 = arith.addf %89, %88 : vector<2x192xf32>
    %91 = arith.divf %89, %90 : vector<2x192xf32>
    %92 = vector.extract_strided_slice %85 {offsets = [0, 192], sizes = [2, 64], strides = [1, 1]} : vector<2x256xf32> to vector<2x64xf32>
    %93 = math.tanh %92 : vector<2x64xf32>
    %94 = vector.extract_strided_slice %91 {offsets = [0, 0], sizes = [2, 64], strides = [1, 1]} : vector<2x192xf32> to vector<2x64xf32>
    %95 = vector.extract_strided_slice %91 {offsets = [0, 64], sizes = [2, 64], strides = [1, 1]} : vector<2x192xf32> to vector<2x64xf32>
    %96 = vector.extract_strided_slice %91 {offsets = [0, 128], sizes = [2, 64], strides = [1, 1]} : vector<2x192xf32> to vector<2x64xf32>
    %97 = arith.mulf %95, %56 : vector<2x64xf32>
    %98 = arith.mulf %94, %93 : vector<2x64xf32>
    %99 = arith.addf %97, %98 : vector<2x64xf32>
    %100 = math.tanh %99 : vector<2x64xf32>
    %101 = arith.mulf %96, %100 : vector<2x64xf32>
    %102 = arith.truncf %81 : vector<2x64xf32> to vector<2x64xbf16>
    %cst_30 = arith.constant dense<0.000000e+00> : vector<2x256xf32>
    %103 = tpu.matmul %102, %3, %cst_30 {dimension_numbers = #tpu.dot_dimension_numbers<[1], [0], [0], [1], [0, 0, 1, 1], [], []>} : vector<2x64xbf16>, vector<64x256xbf16>, vector<2x256xf32> -> vector<2x256xf32>
    %104 = arith.truncf %58 : vector<2x64xf32> to vector<2x64xbf16>
    %cst_31 = arith.constant dense<0.000000e+00> : vector<2x256xf32>
    %105 = tpu.matmul %104, %5, %cst_31 {dimension_numbers = #tpu.dot_dimension_numbers<[1], [0], [0], [1], [0, 0, 1, 1], [], []>} : vector<2x64xbf16>, vector<64x256xbf16>, vector<2x256xf32> -> vector<2x256xf32>
    %106 = arith.addf %105, %103 : vector<2x256xf32>
    %107 = vector.broadcast %9 : vector<1x256xf32> to vector<2x256xf32>
    %108 = arith.addf %106, %107 : vector<2x256xf32>
    %109 = vector.extract_strided_slice %108 {offsets = [0, 0], sizes = [2, 192], strides = [1, 1]} : vector<2x256xf32> to vector<2x192xf32>
    %110 = arith.negf %109 : vector<2x192xf32>
    %111 = math.exp %110 : vector<2x192xf32>
    %cst_32 = arith.constant 1.000000e+00 : f32
    %112 = vector.broadcast %cst_32 : f32 to vector<2x192xf32>
    %113 = arith.addf %112, %111 : vector<2x192xf32>
    %114 = arith.divf %112, %113 : vector<2x192xf32>
    %115 = vector.extract_strided_slice %108 {offsets = [0, 192], sizes = [2, 64], strides = [1, 1]} : vector<2x256xf32> to vector<2x64xf32>
    %116 = math.tanh %115 : vector<2x64xf32>
    %117 = vector.extract_strided_slice %114 {offsets = [0, 0], sizes = [2, 64], strides = [1, 1]} : vector<2x192xf32> to vector<2x64xf32>
    %118 = vector.extract_strided_slice %114 {offsets = [0, 64], sizes = [2, 64], strides = [1, 1]} : vector<2x192xf32> to vector<2x64xf32>
    %119 = vector.extract_strided_slice %114 {offsets = [0, 128], sizes = [2, 64], strides = [1, 1]} : vector<2x192xf32> to vector<2x64xf32>
    %120 = arith.mulf %118, %79 : vector<2x64xf32>
    %121 = arith.mulf %117, %116 : vector<2x64xf32>
    %122 = arith.addf %120, %121 : vector<2x64xf32>
    %123 = math.tanh %122 : vector<2x64xf32>
    %124 = arith.mulf %119, %123 : vector<2x64xf32>
    %125 = arith.truncf %101 : vector<2x64xf32> to vector<2x64xbf16>
    %cst_33 = arith.constant dense<0.000000e+00> : vector<2x256xf32>
    %126 = tpu.matmul %125, %1, %cst_33 {dimension_numbers = #tpu.dot_dimension_numbers<[1], [0], [0], [1], [0, 0, 1, 1], [], []>} : vector<2x64xbf16>, vector<64x256xbf16>, vector<2x256xf32> -> vector<2x256xf32>
    %127 = vector.extract_strided_slice %14 {offsets = [6, 0], sizes = [2, 256], strides = [1, 1]} : vector<16x256xf32> to vector<2x256xf32>
    %128 = arith.addf %127, %126 : vector<2x256xf32>
    %129 = vector.extract_strided_slice %128 {offsets = [0, 0], sizes = [2, 192], strides = [1, 1]} : vector<2x256xf32> to vector<2x192xf32>
    %130 = arith.negf %129 : vector<2x192xf32>
    %131 = math.exp %130 : vector<2x192xf32>
    %cst_34 = arith.constant 1.000000e+00 : f32
    %132 = vector.broadcast %cst_34 : f32 to vector<2x192xf32>
    %133 = arith.addf %132, %131 : vector<2x192xf32>
    %134 = arith.divf %132, %133 : vector<2x192xf32>
    %135 = vector.extract_strided_slice %128 {offsets = [0, 192], sizes = [2, 64], strides = [1, 1]} : vector<2x256xf32> to vector<2x64xf32>
    %136 = math.tanh %135 : vector<2x64xf32>
    %137 = vector.extract_strided_slice %134 {offsets = [0, 0], sizes = [2, 64], strides = [1, 1]} : vector<2x192xf32> to vector<2x64xf32>
    %138 = vector.extract_strided_slice %134 {offsets = [0, 64], sizes = [2, 64], strides = [1, 1]} : vector<2x192xf32> to vector<2x64xf32>
    %139 = vector.extract_strided_slice %134 {offsets = [0, 128], sizes = [2, 64], strides = [1, 1]} : vector<2x192xf32> to vector<2x64xf32>
    %140 = arith.mulf %138, %99 : vector<2x64xf32>
    %141 = arith.mulf %137, %136 : vector<2x64xf32>
    %142 = arith.addf %140, %141 : vector<2x64xf32>
    %143 = math.tanh %142 : vector<2x64xf32>
    %144 = arith.mulf %139, %143 : vector<2x64xf32>
    %145 = arith.truncf %124 : vector<2x64xf32> to vector<2x64xbf16>
    %cst_35 = arith.constant dense<0.000000e+00> : vector<2x256xf32>
    %146 = tpu.matmul %145, %3, %cst_35 {dimension_numbers = #tpu.dot_dimension_numbers<[1], [0], [0], [1], [0, 0, 1, 1], [], []>} : vector<2x64xbf16>, vector<64x256xbf16>, vector<2x256xf32> -> vector<2x256xf32>
    %147 = arith.truncf %101 : vector<2x64xf32> to vector<2x64xbf16>
    %cst_36 = arith.constant dense<0.000000e+00> : vector<2x256xf32>
    %148 = tpu.matmul %147, %5, %cst_36 {dimension_numbers = #tpu.dot_dimension_numbers<[1], [0], [0], [1], [0, 0, 1, 1], [], []>} : vector<2x64xbf16>, vector<64x256xbf16>, vector<2x256xf32> -> vector<2x256xf32>
    %149 = arith.addf %148, %146 : vector<2x256xf32>
    %150 = vector.broadcast %9 : vector<1x256xf32> to vector<2x256xf32>
    %151 = arith.addf %149, %150 : vector<2x256xf32>
    %152 = vector.extract_strided_slice %151 {offsets = [0, 0], sizes = [2, 192], strides = [1, 1]} : vector<2x256xf32> to vector<2x192xf32>
    %153 = arith.negf %152 : vector<2x192xf32>
    %154 = math.exp %153 : vector<2x192xf32>
    %cst_37 = arith.constant 1.000000e+00 : f32
    %155 = vector.broadcast %cst_37 : f32 to vector<2x192xf32>
    %156 = arith.addf %155, %154 : vector<2x192xf32>
    %157 = arith.divf %155, %156 : vector<2x192xf32>
    %158 = vector.extract_strided_slice %151 {offsets = [0, 192], sizes = [2, 64], strides = [1, 1]} : vector<2x256xf32> to vector<2x64xf32>
    %159 = math.tanh %158 : vector<2x64xf32>
    %160 = vector.extract_strided_slice %157 {offsets = [0, 0], sizes = [2, 64], strides = [1, 1]} : vector<2x192xf32> to vector<2x64xf32>
    %161 = vector.extract_strided_slice %157 {offsets = [0, 64], sizes = [2, 64], strides = [1, 1]} : vector<2x192xf32> to vector<2x64xf32>
    %162 = vector.extract_strided_slice %157 {offsets = [0, 128], sizes = [2, 64], strides = [1, 1]} : vector<2x192xf32> to vector<2x64xf32>
    %163 = arith.mulf %161, %122 : vector<2x64xf32>
    %164 = arith.mulf %160, %159 : vector<2x64xf32>
    %165 = arith.addf %163, %164 : vector<2x64xf32>
    %166 = math.tanh %165 : vector<2x64xf32>
    %167 = arith.mulf %162, %166 : vector<2x64xf32>
    %168 = arith.truncf %144 : vector<2x64xf32> to vector<2x64xbf16>
    %cst_38 = arith.constant dense<0.000000e+00> : vector<2x256xf32>
    %169 = tpu.matmul %168, %1, %cst_38 {dimension_numbers = #tpu.dot_dimension_numbers<[1], [0], [0], [1], [0, 0, 1, 1], [], []>} : vector<2x64xbf16>, vector<64x256xbf16>, vector<2x256xf32> -> vector<2x256xf32>
    %170 = vector.extract_strided_slice %14 {offsets = [8, 0], sizes = [2, 256], strides = [1, 1]} : vector<16x256xf32> to vector<2x256xf32>
    %171 = arith.addf %170, %169 : vector<2x256xf32>
    %172 = vector.extract_strided_slice %171 {offsets = [0, 0], sizes = [2, 192], strides = [1, 1]} : vector<2x256xf32> to vector<2x192xf32>
    %173 = arith.negf %172 : vector<2x192xf32>
    %174 = math.exp %173 : vector<2x192xf32>
    %cst_39 = arith.constant 1.000000e+00 : f32
    %175 = vector.broadcast %cst_39 : f32 to vector<2x192xf32>
    %176 = arith.addf %175, %174 : vector<2x192xf32>
    %177 = arith.divf %175, %176 : vector<2x192xf32>
    %178 = vector.extract_strided_slice %171 {offsets = [0, 192], sizes = [2, 64], strides = [1, 1]} : vector<2x256xf32> to vector<2x64xf32>
    %179 = math.tanh %178 : vector<2x64xf32>
    %180 = vector.extract_strided_slice %177 {offsets = [0, 0], sizes = [2, 64], strides = [1, 1]} : vector<2x192xf32> to vector<2x64xf32>
    %181 = vector.extract_strided_slice %177 {offsets = [0, 64], sizes = [2, 64], strides = [1, 1]} : vector<2x192xf32> to vector<2x64xf32>
    %182 = vector.extract_strided_slice %177 {offsets = [0, 128], sizes = [2, 64], strides = [1, 1]} : vector<2x192xf32> to vector<2x64xf32>
    %183 = arith.mulf %181, %142 : vector<2x64xf32>
    %184 = arith.mulf %180, %179 : vector<2x64xf32>
    %185 = arith.addf %183, %184 : vector<2x64xf32>
    %186 = math.tanh %185 : vector<2x64xf32>
    %187 = arith.mulf %182, %186 : vector<2x64xf32>
    %188 = arith.truncf %167 : vector<2x64xf32> to vector<2x64xbf16>
    %cst_40 = arith.constant dense<0.000000e+00> : vector<2x256xf32>
    %189 = tpu.matmul %188, %3, %cst_40 {dimension_numbers = #tpu.dot_dimension_numbers<[1], [0], [0], [1], [0, 0, 1, 1], [], []>} : vector<2x64xbf16>, vector<64x256xbf16>, vector<2x256xf32> -> vector<2x256xf32>
    %190 = arith.truncf %144 : vector<2x64xf32> to vector<2x64xbf16>
    %cst_41 = arith.constant dense<0.000000e+00> : vector<2x256xf32>
    %191 = tpu.matmul %190, %5, %cst_41 {dimension_numbers = #tpu.dot_dimension_numbers<[1], [0], [0], [1], [0, 0, 1, 1], [], []>} : vector<2x64xbf16>, vector<64x256xbf16>, vector<2x256xf32> -> vector<2x256xf32>
    %192 = arith.addf %191, %189 : vector<2x256xf32>
    %193 = vector.broadcast %9 : vector<1x256xf32> to vector<2x256xf32>
    %194 = arith.addf %192, %193 : vector<2x256xf32>
    %195 = vector.extract_strided_slice %194 {offsets = [0, 0], sizes = [2, 192], strides = [1, 1]} : vector<2x256xf32> to vector<2x192xf32>
    %196 = arith.negf %195 : vector<2x192xf32>
    %197 = math.exp %196 : vector<2x192xf32>
    %cst_42 = arith.constant 1.000000e+00 : f32
    %198 = vector.broadcast %cst_42 : f32 to vector<2x192xf32>
    %199 = arith.addf %198, %197 : vector<2x192xf32>
    %200 = arith.divf %198, %199 : vector<2x192xf32>
    %201 = vector.extract_strided_slice %194 {offsets = [0, 192], sizes = [2, 64], strides = [1, 1]} : vector<2x256xf32> to vector<2x64xf32>
    %202 = math.tanh %201 : vector<2x64xf32>
    %203 = vector.extract_strided_slice %200 {offsets = [0, 0], sizes = [2, 64], strides = [1, 1]} : vector<2x192xf32> to vector<2x64xf32>
    %204 = vector.extract_strided_slice %200 {offsets = [0, 64], sizes = [2, 64], strides = [1, 1]} : vector<2x192xf32> to vector<2x64xf32>
    %205 = vector.extract_strided_slice %200 {offsets = [0, 128], sizes = [2, 64], strides = [1, 1]} : vector<2x192xf32> to vector<2x64xf32>
    %206 = arith.mulf %204, %165 : vector<2x64xf32>
    %207 = arith.mulf %203, %202 : vector<2x64xf32>
    %208 = arith.addf %206, %207 : vector<2x64xf32>
    %209 = math.tanh %208 : vector<2x64xf32>
    %210 = arith.mulf %205, %209 : vector<2x64xf32>
    %211 = arith.truncf %187 : vector<2x64xf32> to vector<2x64xbf16>
    %cst_43 = arith.constant dense<0.000000e+00> : vector<2x256xf32>
    %212 = tpu.matmul %211, %1, %cst_43 {dimension_numbers = #tpu.dot_dimension_numbers<[1], [0], [0], [1], [0, 0, 1, 1], [], []>} : vector<2x64xbf16>, vector<64x256xbf16>, vector<2x256xf32> -> vector<2x256xf32>
    %213 = vector.extract_strided_slice %14 {offsets = [10, 0], sizes = [2, 256], strides = [1, 1]} : vector<16x256xf32> to vector<2x256xf32>
    %214 = arith.addf %213, %212 : vector<2x256xf32>
    %215 = vector.extract_strided_slice %214 {offsets = [0, 0], sizes = [2, 192], strides = [1, 1]} : vector<2x256xf32> to vector<2x192xf32>
    %216 = arith.negf %215 : vector<2x192xf32>
    %217 = math.exp %216 : vector<2x192xf32>
    %cst_44 = arith.constant 1.000000e+00 : f32
    %218 = vector.broadcast %cst_44 : f32 to vector<2x192xf32>
    %219 = arith.addf %218, %217 : vector<2x192xf32>
    %220 = arith.divf %218, %219 : vector<2x192xf32>
    %221 = vector.extract_strided_slice %214 {offsets = [0, 192], sizes = [2, 64], strides = [1, 1]} : vector<2x256xf32> to vector<2x64xf32>
    %222 = math.tanh %221 : vector<2x64xf32>
    %223 = vector.extract_strided_slice %220 {offsets = [0, 0], sizes = [2, 64], strides = [1, 1]} : vector<2x192xf32> to vector<2x64xf32>
    %224 = vector.extract_strided_slice %220 {offsets = [0, 64], sizes = [2, 64], strides = [1, 1]} : vector<2x192xf32> to vector<2x64xf32>
    %225 = vector.extract_strided_slice %220 {offsets = [0, 128], sizes = [2, 64], strides = [1, 1]} : vector<2x192xf32> to vector<2x64xf32>
    %226 = arith.mulf %224, %185 : vector<2x64xf32>
    %227 = arith.mulf %223, %222 : vector<2x64xf32>
    %228 = arith.addf %226, %227 : vector<2x64xf32>
    %229 = math.tanh %228 : vector<2x64xf32>
    %230 = arith.mulf %225, %229 : vector<2x64xf32>
    %231 = arith.truncf %210 : vector<2x64xf32> to vector<2x64xbf16>
    %cst_45 = arith.constant dense<0.000000e+00> : vector<2x256xf32>
    %232 = tpu.matmul %231, %3, %cst_45 {dimension_numbers = #tpu.dot_dimension_numbers<[1], [0], [0], [1], [0, 0, 1, 1], [], []>} : vector<2x64xbf16>, vector<64x256xbf16>, vector<2x256xf32> -> vector<2x256xf32>
    %233 = arith.truncf %187 : vector<2x64xf32> to vector<2x64xbf16>
    %cst_46 = arith.constant dense<0.000000e+00> : vector<2x256xf32>
    %234 = tpu.matmul %233, %5, %cst_46 {dimension_numbers = #tpu.dot_dimension_numbers<[1], [0], [0], [1], [0, 0, 1, 1], [], []>} : vector<2x64xbf16>, vector<64x256xbf16>, vector<2x256xf32> -> vector<2x256xf32>
    %235 = arith.addf %234, %232 : vector<2x256xf32>
    %236 = vector.broadcast %9 : vector<1x256xf32> to vector<2x256xf32>
    %237 = arith.addf %235, %236 : vector<2x256xf32>
    %238 = vector.extract_strided_slice %237 {offsets = [0, 0], sizes = [2, 192], strides = [1, 1]} : vector<2x256xf32> to vector<2x192xf32>
    %239 = arith.negf %238 : vector<2x192xf32>
    %240 = math.exp %239 : vector<2x192xf32>
    %cst_47 = arith.constant 1.000000e+00 : f32
    %241 = vector.broadcast %cst_47 : f32 to vector<2x192xf32>
    %242 = arith.addf %241, %240 : vector<2x192xf32>
    %243 = arith.divf %241, %242 : vector<2x192xf32>
    %244 = vector.extract_strided_slice %237 {offsets = [0, 192], sizes = [2, 64], strides = [1, 1]} : vector<2x256xf32> to vector<2x64xf32>
    %245 = math.tanh %244 : vector<2x64xf32>
    %246 = vector.extract_strided_slice %243 {offsets = [0, 0], sizes = [2, 64], strides = [1, 1]} : vector<2x192xf32> to vector<2x64xf32>
    %247 = vector.extract_strided_slice %243 {offsets = [0, 64], sizes = [2, 64], strides = [1, 1]} : vector<2x192xf32> to vector<2x64xf32>
    %248 = vector.extract_strided_slice %243 {offsets = [0, 128], sizes = [2, 64], strides = [1, 1]} : vector<2x192xf32> to vector<2x64xf32>
    %249 = arith.mulf %247, %208 : vector<2x64xf32>
    %250 = arith.mulf %246, %245 : vector<2x64xf32>
    %251 = arith.addf %249, %250 : vector<2x64xf32>
    %252 = math.tanh %251 : vector<2x64xf32>
    %253 = arith.mulf %248, %252 : vector<2x64xf32>
    %254 = arith.truncf %230 : vector<2x64xf32> to vector<2x64xbf16>
    %cst_48 = arith.constant dense<0.000000e+00> : vector<2x256xf32>
    %255 = tpu.matmul %254, %1, %cst_48 {dimension_numbers = #tpu.dot_dimension_numbers<[1], [0], [0], [1], [0, 0, 1, 1], [], []>} : vector<2x64xbf16>, vector<64x256xbf16>, vector<2x256xf32> -> vector<2x256xf32>
    %256 = vector.extract_strided_slice %14 {offsets = [12, 0], sizes = [2, 256], strides = [1, 1]} : vector<16x256xf32> to vector<2x256xf32>
    %257 = arith.addf %256, %255 : vector<2x256xf32>
    %258 = vector.extract_strided_slice %257 {offsets = [0, 0], sizes = [2, 192], strides = [1, 1]} : vector<2x256xf32> to vector<2x192xf32>
    %259 = arith.negf %258 : vector<2x192xf32>
    %260 = math.exp %259 : vector<2x192xf32>
    %cst_49 = arith.constant 1.000000e+00 : f32
    %261 = vector.broadcast %cst_49 : f32 to vector<2x192xf32>
    %262 = arith.addf %261, %260 : vector<2x192xf32>
    %263 = arith.divf %261, %262 : vector<2x192xf32>
    %264 = vector.extract_strided_slice %257 {offsets = [0, 192], sizes = [2, 64], strides = [1, 1]} : vector<2x256xf32> to vector<2x64xf32>
    %265 = math.tanh %264 : vector<2x64xf32>
    %266 = vector.extract_strided_slice %263 {offsets = [0, 0], sizes = [2, 64], strides = [1, 1]} : vector<2x192xf32> to vector<2x64xf32>
    %267 = vector.extract_strided_slice %263 {offsets = [0, 64], sizes = [2, 64], strides = [1, 1]} : vector<2x192xf32> to vector<2x64xf32>
    %268 = vector.extract_strided_slice %263 {offsets = [0, 128], sizes = [2, 64], strides = [1, 1]} : vector<2x192xf32> to vector<2x64xf32>
    %269 = arith.mulf %267, %228 : vector<2x64xf32>
    %270 = arith.mulf %266, %265 : vector<2x64xf32>
    %271 = arith.addf %269, %270 : vector<2x64xf32>
    %272 = math.tanh %271 : vector<2x64xf32>
    %273 = arith.mulf %268, %272 : vector<2x64xf32>
    %274 = arith.truncf %253 : vector<2x64xf32> to vector<2x64xbf16>
    %cst_50 = arith.constant dense<0.000000e+00> : vector<2x256xf32>
    %275 = tpu.matmul %274, %3, %cst_50 {dimension_numbers = #tpu.dot_dimension_numbers<[1], [0], [0], [1], [0, 0, 1, 1], [], []>} : vector<2x64xbf16>, vector<64x256xbf16>, vector<2x256xf32> -> vector<2x256xf32>
    %276 = arith.truncf %230 : vector<2x64xf32> to vector<2x64xbf16>
    %cst_51 = arith.constant dense<0.000000e+00> : vector<2x256xf32>
    %277 = tpu.matmul %276, %5, %cst_51 {dimension_numbers = #tpu.dot_dimension_numbers<[1], [0], [0], [1], [0, 0, 1, 1], [], []>} : vector<2x64xbf16>, vector<64x256xbf16>, vector<2x256xf32> -> vector<2x256xf32>
    %278 = arith.addf %277, %275 : vector<2x256xf32>
    %279 = vector.broadcast %9 : vector<1x256xf32> to vector<2x256xf32>
    %280 = arith.addf %278, %279 : vector<2x256xf32>
    %281 = vector.extract_strided_slice %280 {offsets = [0, 0], sizes = [2, 192], strides = [1, 1]} : vector<2x256xf32> to vector<2x192xf32>
    %282 = arith.negf %281 : vector<2x192xf32>
    %283 = math.exp %282 : vector<2x192xf32>
    %cst_52 = arith.constant 1.000000e+00 : f32
    %284 = vector.broadcast %cst_52 : f32 to vector<2x192xf32>
    %285 = arith.addf %284, %283 : vector<2x192xf32>
    %286 = arith.divf %284, %285 : vector<2x192xf32>
    %287 = vector.extract_strided_slice %280 {offsets = [0, 192], sizes = [2, 64], strides = [1, 1]} : vector<2x256xf32> to vector<2x64xf32>
    %288 = math.tanh %287 : vector<2x64xf32>
    %289 = vector.extract_strided_slice %286 {offsets = [0, 0], sizes = [2, 64], strides = [1, 1]} : vector<2x192xf32> to vector<2x64xf32>
    %290 = vector.extract_strided_slice %286 {offsets = [0, 64], sizes = [2, 64], strides = [1, 1]} : vector<2x192xf32> to vector<2x64xf32>
    %291 = vector.extract_strided_slice %286 {offsets = [0, 128], sizes = [2, 64], strides = [1, 1]} : vector<2x192xf32> to vector<2x64xf32>
    %292 = arith.mulf %290, %251 : vector<2x64xf32>
    %293 = arith.mulf %289, %288 : vector<2x64xf32>
    %294 = arith.addf %292, %293 : vector<2x64xf32>
    %295 = math.tanh %294 : vector<2x64xf32>
    %296 = arith.mulf %291, %295 : vector<2x64xf32>
    %297 = arith.truncf %273 : vector<2x64xf32> to vector<2x64xbf16>
    %cst_53 = arith.constant dense<0.000000e+00> : vector<2x256xf32>
    %298 = tpu.matmul %297, %1, %cst_53 {dimension_numbers = #tpu.dot_dimension_numbers<[1], [0], [0], [1], [0, 0, 1, 1], [], []>} : vector<2x64xbf16>, vector<64x256xbf16>, vector<2x256xf32> -> vector<2x256xf32>
    %299 = vector.extract_strided_slice %14 {offsets = [14, 0], sizes = [2, 256], strides = [1, 1]} : vector<16x256xf32> to vector<2x256xf32>
    %300 = arith.addf %299, %298 : vector<2x256xf32>
    %301 = vector.extract_strided_slice %300 {offsets = [0, 0], sizes = [2, 192], strides = [1, 1]} : vector<2x256xf32> to vector<2x192xf32>
    %302 = arith.negf %301 : vector<2x192xf32>
    %303 = math.exp %302 : vector<2x192xf32>
    %cst_54 = arith.constant 1.000000e+00 : f32
    %304 = vector.broadcast %cst_54 : f32 to vector<2x192xf32>
    %305 = arith.addf %304, %303 : vector<2x192xf32>
    %306 = arith.divf %304, %305 : vector<2x192xf32>
    %307 = vector.extract_strided_slice %300 {offsets = [0, 192], sizes = [2, 64], strides = [1, 1]} : vector<2x256xf32> to vector<2x64xf32>
    %308 = math.tanh %307 : vector<2x64xf32>
    %309 = vector.extract_strided_slice %306 {offsets = [0, 0], sizes = [2, 64], strides = [1, 1]} : vector<2x192xf32> to vector<2x64xf32>
    %310 = vector.extract_strided_slice %306 {offsets = [0, 64], sizes = [2, 64], strides = [1, 1]} : vector<2x192xf32> to vector<2x64xf32>
    %311 = vector.extract_strided_slice %306 {offsets = [0, 128], sizes = [2, 64], strides = [1, 1]} : vector<2x192xf32> to vector<2x64xf32>
    %312 = arith.mulf %310, %271 : vector<2x64xf32>
    %313 = arith.mulf %309, %308 : vector<2x64xf32>
    %314 = arith.addf %312, %313 : vector<2x64xf32>
    %315 = math.tanh %314 : vector<2x64xf32>
    %316 = arith.mulf %311, %315 : vector<2x64xf32>
    %317 = arith.truncf %296 : vector<2x64xf32> to vector<2x64xbf16>
    %cst_55 = arith.constant dense<0.000000e+00> : vector<2x256xf32>
    %318 = tpu.matmul %317, %3, %cst_55 {dimension_numbers = #tpu.dot_dimension_numbers<[1], [0], [0], [1], [0, 0, 1, 1], [], []>} : vector<2x64xbf16>, vector<64x256xbf16>, vector<2x256xf32> -> vector<2x256xf32>
    %319 = arith.truncf %273 : vector<2x64xf32> to vector<2x64xbf16>
    %cst_56 = arith.constant dense<0.000000e+00> : vector<2x256xf32>
    %320 = tpu.matmul %319, %5, %cst_56 {dimension_numbers = #tpu.dot_dimension_numbers<[1], [0], [0], [1], [0, 0, 1, 1], [], []>} : vector<2x64xbf16>, vector<64x256xbf16>, vector<2x256xf32> -> vector<2x256xf32>
    %321 = arith.addf %320, %318 : vector<2x256xf32>
    %322 = vector.broadcast %9 : vector<1x256xf32> to vector<2x256xf32>
    %323 = arith.addf %321, %322 : vector<2x256xf32>
    %324 = vector.extract_strided_slice %323 {offsets = [0, 0], sizes = [2, 192], strides = [1, 1]} : vector<2x256xf32> to vector<2x192xf32>
    %325 = arith.negf %324 : vector<2x192xf32>
    %326 = math.exp %325 : vector<2x192xf32>
    %cst_57 = arith.constant 1.000000e+00 : f32
    %327 = vector.broadcast %cst_57 : f32 to vector<2x192xf32>
    %328 = arith.addf %327, %326 : vector<2x192xf32>
    %329 = arith.divf %327, %328 : vector<2x192xf32>
    %330 = vector.extract_strided_slice %323 {offsets = [0, 192], sizes = [2, 64], strides = [1, 1]} : vector<2x256xf32> to vector<2x64xf32>
    %331 = math.tanh %330 : vector<2x64xf32>
    %332 = vector.extract_strided_slice %329 {offsets = [0, 0], sizes = [2, 64], strides = [1, 1]} : vector<2x192xf32> to vector<2x64xf32>
    %333 = vector.extract_strided_slice %329 {offsets = [0, 64], sizes = [2, 64], strides = [1, 1]} : vector<2x192xf32> to vector<2x64xf32>
    %334 = vector.extract_strided_slice %329 {offsets = [0, 128], sizes = [2, 64], strides = [1, 1]} : vector<2x192xf32> to vector<2x64xf32>
    %335 = arith.mulf %333, %294 : vector<2x64xf32>
    %336 = arith.mulf %332, %331 : vector<2x64xf32>
    %337 = arith.addf %335, %336 : vector<2x64xf32>
    %338 = math.tanh %337 : vector<2x64xf32>
    %339 = arith.mulf %334, %338 : vector<2x64xf32>
    %340 = arith.truncf %339 : vector<2x64xf32> to vector<2x64xbf16>
    %cst_58 = arith.constant dense<0.000000e+00> : vector<2x256xf32>
    %341 = tpu.matmul %340, %3, %cst_58 {dimension_numbers = #tpu.dot_dimension_numbers<[1], [0], [0], [1], [0, 0, 1, 1], [], []>} : vector<2x64xbf16>, vector<64x256xbf16>, vector<2x256xf32> -> vector<2x256xf32>
    %342 = arith.truncf %316 : vector<2x64xf32> to vector<2x64xbf16>
    %cst_59 = arith.constant dense<0.000000e+00> : vector<2x256xf32>
    %343 = tpu.matmul %342, %5, %cst_59 {dimension_numbers = #tpu.dot_dimension_numbers<[1], [0], [0], [1], [0, 0, 1, 1], [], []>} : vector<2x64xbf16>, vector<64x256xbf16>, vector<2x256xf32> -> vector<2x256xf32>
    %344 = arith.addf %343, %341 : vector<2x256xf32>
    %345 = vector.broadcast %9 : vector<1x256xf32> to vector<2x256xf32>
    %346 = arith.addf %344, %345 : vector<2x256xf32>
    %347 = vector.extract_strided_slice %346 {offsets = [0, 0], sizes = [2, 192], strides = [1, 1]} : vector<2x256xf32> to vector<2x192xf32>
    %348 = arith.negf %347 : vector<2x192xf32>
    %349 = math.exp %348 : vector<2x192xf32>
    %cst_60 = arith.constant 1.000000e+00 : f32
    %350 = vector.broadcast %cst_60 : f32 to vector<2x192xf32>
    %351 = arith.addf %350, %349 : vector<2x192xf32>
    %352 = arith.divf %350, %351 : vector<2x192xf32>
    %353 = vector.extract_strided_slice %346 {offsets = [0, 192], sizes = [2, 64], strides = [1, 1]} : vector<2x256xf32> to vector<2x64xf32>
    %354 = math.tanh %353 : vector<2x64xf32>
    %355 = vector.extract_strided_slice %352 {offsets = [0, 0], sizes = [2, 64], strides = [1, 1]} : vector<2x192xf32> to vector<2x64xf32>
    %356 = vector.extract_strided_slice %352 {offsets = [0, 64], sizes = [2, 64], strides = [1, 1]} : vector<2x192xf32> to vector<2x64xf32>
    %357 = vector.extract_strided_slice %352 {offsets = [0, 128], sizes = [2, 64], strides = [1, 1]} : vector<2x192xf32> to vector<2x64xf32>
    %358 = arith.mulf %356, %337 : vector<2x64xf32>
    %359 = arith.mulf %355, %354 : vector<2x64xf32>
    %360 = arith.addf %358, %359 : vector<2x64xf32>
    %361 = math.tanh %360 : vector<2x64xf32>
    %362 = arith.mulf %357, %361 : vector<2x64xf32>
    %363 = arith.truncf %362 : vector<2x64xf32> to vector<2x64xbf16>
    %c0_61 = arith.constant 0 : index
    %c0_62 = arith.constant 0 : index
    %364 = vector.load %arg5[%c0_61, %c0_62] : memref<64x5xbf16, #tpu.memory_space<vmem>>, vector<64x5xbf16>
    %cst_63 = arith.constant dense<0.000000e+00> : vector<2x5xf32>
    %365 = tpu.matmul %363, %364, %cst_63 {dimension_numbers = #tpu.dot_dimension_numbers<[1], [0], [0], [1], [0, 0, 1, 1], [], []>} : vector<2x64xbf16>, vector<64x5xbf16>, vector<2x5xf32> -> vector<2x5xf32>
    %c0_64 = arith.constant 0 : index
    %c0_65 = arith.constant 0 : index
    %366 = vector.load %arg6[%c0_64, %c0_65] : memref<1x5xf32, #tpu.memory_space<vmem>>, vector<1x5xf32>
    %367 = vector.broadcast %366 : vector<1x5xf32> to vector<2x5xf32>
    %368 = arith.addf %365, %367 : vector<2x5xf32>
    %c0_66 = arith.constant 0 : index
    %c0_67 = arith.constant 0 : index
    %369 = vector.load %arg7[%c0_66, %c0_67] : memref<2x5xf32, #tpu.memory_space<vmem>>, vector<2x5xf32>
    tpu.vector_store %arg7[%c0_66, %c0_67], %368 {strides = array<i32>} : memref<2x5xf32, #tpu.memory_space<vmem>>, vector<2x5xf32>,
    return
  }
}

</mosaic_0001>

<bundles_post_ra>
// kernel: tpu_custom_call.1
= control target key start
LH: loop header
LB: loop body
LE: loop exit
PB: predicated region body
PF: predicated region fallthrough
CT: control target
= control target key end

     0   :  { %12 = vsyncpa [#allocation3], 0  ;;  %s3152_s0 = inlined_call_operand.vmem [shape: bf16[16,16], index: 0, kind: input, shape index: {}]   ;;  %s3153_s1 = inlined_call_operand.vmem [shape: bf16[16,256], index: 1, kind: input, shape index: {}]   ;;  %s3154_s2 = inlined_call_operand.hbm [shape: bf16[1,64,256], index: 2, kind: input, shape index: {}]   ;;  %s3155_s3 = inlined_call_operand.hbm [shape: bf16[2,64,256], index: 3, kind: input, shape index: {}]   ;;  %s3156_s4 = inlined_call_operand.vmem [shape: f32[2,1,256], index: 4, kind: input, shape index: {}]   ;;  %s3157_s5 = inlined_call_operand.vmem [shape: bf16[64,5], index: 5, kind: input, shape index: {}]   ;;  %s3158_s6 = inlined_call_operand.vmem [shape: f32[1,5], index: 6, kind: input, shape index: {}]   ;;  %s3159_s7 = inlined_call_operand.hbm [shape: f32[2,5], index: 7, kind: output, shape index: {}]  }
   0x1   :  { %13 = vsyncpa [#allocation6], 0 }
   0x2   :  { %14 = vsyncpa [#allocation4], 0  ;;  %s23_s26 = sshll.u32 %s3154_s2, 4  ;;  %s2540_s27 = smov [#allocation2]   ;;  %s24_s26 = int_to_ptr.hbm [resolvable:$true] %s23_s26 }
   0x3   :  { %s25_s28 = sshll.u32 %s2540_s27, 4  ;;  %s36_s8 = sshll.u32 %s3155_s3, 4  ;;  %s26_s28 = int_to_ptr.vmem [resolvable:$true] %s25_s28  ;;  %s37_s8 = int_to_ptr.hbm [resolvable:$true] %s36_s8 }
   0x4   :  { %s2541_s9 = smov 128   ;;  %s2542_s10 = smov 8  }
   0x5   :  { %31 = dma.hbm_to_vmem [thread:$0]  %s24_s26, 1024, %s26_s28, [#allocation3], %s2541_s9, %s2541_s9, %s2542_s10  }
   0x6   :  { %s2543_s11 = smov [#allocation5]  }
   0x7   :  { %s38_s12 = sshll.u32 %s2543_s11, 4  ;;  %s39_s12 = int_to_ptr.vmem [resolvable:$true] %s38_s12 }
   0x8   :  { %44 = dma.hbm_to_vmem [thread:$0]  %s37_s8, 2048, %s39_s12, [#allocation6], %s2541_s9, %s2541_s9, %s2542_s10  }
   0x9   :  { %2534 = dma.done.wait [#allocation3], 1024  }
   0xa   :  { %2535 = vsyncadd [#allocation3], 4294966272 }
   0xb   :  { %2536 = dma.done.wait [#allocation6], 2048  }
   0xc   :  { %2537 = vsyncadd [#allocation6], 4294965248  ;;  %v2237_v0 = vld [vmem:[#allocation5 + $0x34] sm:$0xf]  ;;  %v2070_v1 = vld [vmem:[#allocation5 + $0x38] sm:$0xf0] }
   0xd   :  { %v2235_v2 = vld [vmem:[#allocation5 + $0x24] sm:$0xf]  ;;  %v2593_v3 = vor.u32 %v2237_v0, %v2070_v1  ;;  %v2062_v4 = vld [vmem:[#allocation5 + $0x28] sm:$0xf0]  ;;  %vm112_vm0 = vcmask 130048   ;;  %v2544_v31 = vmov 0  }
   0xe   :  { %v2256_v5 = vld [vmem:[%s3153_s1 + $0x4] sm:$0xf]  ;;  %v2036_v6 = vld [vmem:[%s3153_s1 + $0x8] sm:$0xf0]  ;;  %v2602_v8 = vor.u32 %v2235_v2, %v2062_v4  ;;  %v2068_v10 = vld [vmem:[#allocation5 + $0x30] sm:$0xf] }
   0xf   :  { %v2039_v7 = vor.u32 %v2256_v5, %v2036_v6  ;;  %205 = vmatpush.bf16.msra.mxu3 %v2593_v3  ;;  %v2255_v9 = vld [vmem:[%s3152_s0] sm:$0xff]  ;;  %v2233_v11 = vld [vmem:[#allocation5 + $0x14] sm:$0xf]  ;;  %v2054_v12 = vld [vmem:[#allocation5 + $0x18] sm:$0xf0]  ;;  %s2545_s21 = smov 64  }
  0x10   :  { %v2238_v13 = vld [vmem:[#allocation5 + $0x34] sm:$0xf0]  ;;  %v2060_v15 = vld [vmem:[#allocation5 + $0x20] sm:$0xf]  ;;  %v2236_v16 = vld [vmem:[#allocation5 + $0x24] sm:$0xf0]  ;;  %v2617_v19 = vor.u32 %v2233_v11, %v2054_v12 }
  0x11   :  { %137 = vmatpush.bf16.msra.mxu1 %v2039_v7  ;;  %v2607_v14 = vor.u32 %v2238_v13, %v2068_v10  ;;  %v2034_v17 = vld [vmem:[%s3153_s1] sm:$0xf]  ;;  %v2257_v18 = vld [vmem:[%s3153_s1 + $0x4] sm:$0xf0]  ;;  %v2231_v21 = vld [vmem:[#allocation5 + $0x4] sm:$0xf]  ;;  %v2621_v23 = vor.u32 %v2236_v16, %v2060_v15 }
  0x12   :  { %v2035_v20 = vor.u32 %v2257_v18, %v2034_v17  ;;  %v2046_v22 = vld [vmem:[#allocation5 + $0x8] sm:$0xf0]  ;;  %v2052_v24 = vld [vmem:[#allocation5 + $0x10] sm:$0xf]  ;;  %v2234_v25 = vld [vmem:[#allocation5 + $0x14] sm:$0xf0] }
  0x13   :  { %206 = vmatpush.bf16.msra.mxu3 %v2602_v8  ;;  %192 = vmatpush.bf16.msra.mxu2 %v2607_v14  ;;  %v2626_v26 = vor.u32 %v2231_v21, %v2046_v22  ;;  %v2629_v27 = vor.u32 %v2234_v25, %v2052_v24  ;;  %v2044_v28 = vld [vmem:[#allocation5] sm:$0xf]  ;;  %v2232_v29 = vld [vmem:[#allocation5 + $0x4] sm:$0xf0]  ;;  %v2106_v61 = vld [vmem:[#allocation5 + $0x70] sm:$0xf] }
  0x14   :  { %2041 = vmatmul.msk.bf16.vlgmr.msra.gmra.mxu1 %vm112_vm0, %v2255_v9  ;;  %123 = vmatpush.bf16.msra.mxu0 %v2035_v20  ;;  %v2636_v30 = vor.u32 %v2232_v29, %v2044_v28  ;;  %v2647_v32 = vld [vmem:[%s3156_s4] sm:$0x3]  ;;  %v2246_v62 = vld [vmem:[#allocation5 + $0x74] sm:$0xf0]  ;;  %v2245_v63 = vld [vmem:[#allocation5 + $0x74] sm:$0xf] }
  0x15   :  { %293 = vmatpush.bf16.msrb.mxu1 %v2593_v3  ;;  %v94_v33 = vperm.slane %v2647_v32, 1  ;;  %v93_v42 = vperm.slane %v2647_v32, 0  ;;  %v2663_v0 = vor.u32 %v2246_v62, %v2106_v61  ;;  %v2108_v1 = vld [vmem:[#allocation5 + $0x78] sm:$0xf0]  ;;  %v2098_v12 = vld [vmem:[#allocation5 + $0x60] sm:$0xf] }
  0x16   :  { %v2665_v2 = vor.u32 %v2245_v63, %v2108_v1  ;;  %v2244_v13 = vld [vmem:[#allocation5 + $0x64] sm:$0xf0]  ;;  %v2243_v15 = vld [vmem:[#allocation5 + $0x64] sm:$0xf]  ;;  %v2100_v17 = vld [vmem:[#allocation5 + $0x68] sm:$0xf0] }
  0x17   :  { %207 = vmatpush.bf16.msra.mxu3 %v2617_v19  ;;  %193 = vmatpush.bf16.msra.mxu2 %v2621_v23  ;;  %v2675_v16 = vor.u32 %v2244_v13, %v2098_v12  ;;  %v2677_v18 = vor.u32 %v2243_v15, %v2100_v17  ;;  %v2138_v20 = vld [vmem:[#allocation2 + $0x30] sm:$0xf]  ;;  %v2254_v21 = vld [vmem:[#allocation2 + $0x34] sm:$0xf0]  ;;  %v2253_v24 = vld [vmem:[#allocation2 + $0x34] sm:$0xf] }
  0x18   :  { %280 = vmatpush.bf16.msrb.mxu0 %v2607_v14  ;;  %v2681_v22 = vor.u32 %v2254_v21, %v2138_v20  ;;  %v2140_v25 = vld [vmem:[#allocation2 + $0x38] sm:$0xf0]  ;;  %v2090_v29 = vld [vmem:[#allocation5 + $0x50] sm:$0xf]  ;;  %v2114_v61 = vld [vmem:[#allocation2] sm:$0xf] }
  0x19   :  { %294 = vmatpush.bf16.msrb.mxu1 %v2602_v8  ;;  %2040 = vmatmul.msk.bf16.vlgmr.msra.gmra.mxu0 %vm112_vm0, %v2255_v9  ;;  %v2684_v28 = vor.u32 %v2253_v24, %v2140_v25  ;;  %v2248_v62 = vld [vmem:[#allocation2 + $0x4] sm:$0xf0]  ;;  %v2247_v63 = vld [vmem:[#allocation2 + $0x4] sm:$0xf]  ;;  %v2116_v1 = vld [vmem:[#allocation2 + $0x8] sm:$0xf0] }
  0x1a   :  { %vm184_vm9 = vcmask 523264   ;;  %s2546_s9 = smov [#allocation7]   ;;  %s2016_s2 = sshll.u32 %s3159_s7, 4  ;;  %s2017_s2 = int_to_ptr.hbm [resolvable:$true] %s2016_s2 }
  0x1b   :  { %208 = vmatpush.bf16.msra.mxu3 %v2626_v26  ;;  %194 = vmatpush.bf16.msra.mxu2 %v2629_v27  ;;  %s2014_s10 = sshll.u32 %s2546_s9, 4  ;;  %s2015_s10 = int_to_ptr.vmem [resolvable:$true] %s2014_s10 }
  0x1c   :  { %281 = vmatpush.bf16.msrb.mxu0 %v2621_v23 }
  0x1d   :  { %295 = vmatpush.bf16.msrb.mxu1 %v2617_v19 }
  0x1e   :  { %209 = vmatmul.bf16.vlgmr.msra.gmra.mxu3 %v2544_v31 }
  0x1f   :  { %195 = vmatpush.bf16.msra.mxu2 %v2636_v30  ;;  %426 = vmatpush.bf16.msrb.mxu3 %v2665_v2 }
  0x20   :  { %282 = vmatpush.bf16.msrb.mxu0 %v2629_v27 }
  0x21   :  { %296 = vmatpush.bf16.msrb.mxu1 %v2626_v26 }
  0x22   :  { %196 = vmatmul.bf16.vlgmr.msra.gmra.mxu2 %v2544_v31 }
  0x23   :  { %413 = vmatpush.bf16.msrb.mxu2 %v2663_v0  ;;  %427 = vmatpush.bf16.msrb.mxu3 %v2677_v18 }
  0x24   :  { %283 = vmatpush.bf16.msrb.mxu0 %v2636_v30 }
  0x25   :  { %492 = vmatpush.bf16.msra.mxu1 %v2684_v28 }
  0x27   :  { %414 = vmatpush.bf16.msrb.mxu2 %v2675_v16 }
  0x28   :  { %479 = vmatpush.bf16.msra.mxu0 %v2681_v22 }
  0x91   :  { %v139_v34 = vpop.f32.mrf.mxu1 }
  0x92   :  { %v2652_v35 = vadd.f32 %v139_v34, %v94_v33  ;;  %v2242_v34 = vld [vmem:[#allocation5 + $0x54] sm:$0xf0] }
  0x96   :  { %v125_v43 = vpop.f32.mrf.mxu0 }
  0x97   :  { %v2659_v44 = vadd.f32 %v125_v43, %v93_v42 }
  0xa1   :  { %v210_v36 = vpop.f32.mrf.mxu3 }
  0xa2   :  { %v215_v37 = vadd.f32 %v210_v36, %v2652_v35  ;;  %v2241_v36 = vld [vmem:[#allocation5 + $0x54] sm:$0xf] }
  0xa4   :  { %2270 = vtanh.f32 %v215_v37  ;;  %v2075_v9 = vmul.f32 -1.442695, %v215_v37  ;;  %v2687_v37 = vor.u32 %v2242_v34, %v2090_v29  ;;  %v2760_v34 = vpop.f32.mrf.mxu1 }
  0xa5   :  { %v197_v38 = vpop.f32.mrf.mxu2 }
  0xa6   :  { %v214_v45 = vadd.f32 %v197_v38, %v2659_v44  ;;  %v2092_v38 = vld [vmem:[#allocation5 + $0x58] sm:$0xf0]  ;;  %415 = vmatpush.bf16.msrb.mxu2 %v2687_v37 }
  0xa8   :  { %v2074_v46 = vmul.f32 -1.442695, %v214_v45  ;;  %v2251_v45 = vld [vmem:[#allocation2 + $0x24] sm:$0xf] }
  0xa9   :  { %v212_v39 = vpop.f32.mrf.mxu3 }
  0xaa   :  { %v2271_v40 = vpop.eup %2270  ;;  %2272 = vpow2.f32 %v2074_v46  ;;  %v2130_v39 = vld [vmem:[#allocation2 + $0x20] sm:$0xf]  ;;  %v2132_v46 = vld [vmem:[#allocation2 + $0x28] sm:$0xf0] }
  0xab   :  { %257 = vrot.lane.b32.xlu0 %v2271_v40, %s2545_s21  ;;  %v2252_v40 = vld [vmem:[#allocation2 + $0x24] sm:$0xf0] }
  0xac   :  { %v2692_v43 = vor.u32 %v2252_v40, %v2130_v39 }
  0xad   :  { %v199_v41 = vpop.f32.mrf.mxu2 }
  0xae   :  { %v2690_v41 = vor.u32 %v2241_v36, %v2092_v38  ;;  %480 = vmatpush.bf16.msra.mxu0 %v2692_v43  ;;  %v2762_v36 = vpop.f32.mrf.mxu0 }
  0xb0   :  { %v2273_v47 = vpop.eup %2272  ;;  %428 = vmatpush.bf16.msrb.mxu3 %v2690_v41 }
  0xb1   :  { %v222_v48 = vadd.f32 1.0, %v2273_v47  ;;  %v2082_v47 = vld [vmem:[#allocation5 + $0x40] sm:$0xf] }
  0xb3   :  { %2274 = vrcp.f32 %v222_v48  ;;  %vm229_vm1 = vweird.f32 %v222_v48  ;;  %v235_v53 = vand.u32 2147483648, %v222_v48  ;;  %v233_v55 = vand.u32 2147483647, %v222_v48 }
  0xb5   :  { %v236_v56 = vor.u32 1.1754944e-38, %v235_v53  ;;  %vm234_vm4 = vcmp.eq.f32.partialorder %v233_v55, 8.507059e+37  ;;  %v2250_v55 = vld [vmem:[#allocation2 + $0x14] sm:$0xf0] }
  0xb9   :  { %v2275_v49 = vpop.eup %2274 }
  0xba   :  { %v225_v50 = vmul.f32 %v2275_v49, %v222_v48  ;;  %vm230_vm2 = vweird.f32 %v2275_v49  ;;  %v2695_v48 = vor.u32 %v2251_v45, %v2132_v46 }
  0xbb   :  { %vm231_vm3 = vmor %vm229_vm1, %vm230_vm2 }
  0xbc   :  { %v226_v51 = vsub.f32 1.0, %v225_v50  ;;  %v2239_v50 = vld [vmem:[#allocation5 + $0x44] sm:$0xf]  ;;  %493 = vmatpush.bf16.msra.mxu1 %v2695_v48 }
  0xbe   :  { %v227_v52 = vmul.f32 %v2275_v49, %v226_v51  ;;  %v2084_v51 = vld [vmem:[#allocation5 + $0x48] sm:$0xf0] }
  0xbf   :  { %v2700_v53 = vor.u32 %v2239_v50, %v2084_v51 }
  0xc0   :  { %v228_v54 = vadd.f32 %v2275_v49, %v227_v52 }
  0xc1   :  { %429 = vmatpush.bf16.msrb.mxu3 %v2700_v53 }
  0xc2   :  { %v232_v57 = vsel %vm231_vm3, %v2275_v49, %v228_v54  ;;  %v2240_v49 = vld [vmem:[#allocation5 + $0x44] sm:$0xf0]  ;;  %v2122_v54 = vld [vmem:[#allocation2 + $0x10] sm:$0xf] }
  0xc3   :  { %v237_v58 = vsel %vm234_vm4, %v236_v56, %v232_v57  ;;  %v2698_v52 = vor.u32 %v2240_v49, %v2082_v47  ;;  %v2249_v56 = vld [vmem:[#allocation2 + $0x14] sm:$0xf] }
  0xc4   :  { %v255_v4 = vmul.f32 0.0, %v237_v58  ;;  %430 = vmatmul.bf16.vlgmr.msrb.gmra.mxu3 %v2544_v31 }
  0xc5   :  { %416 = vmatpush.bf16.msrb.mxu2 %v2698_v52  ;;  %587 = vmatpush.bf16.msra.mxu3 %v2593_v3 }
  0xc8   :  { %417 = vmatmul.bf16.vlgmr.msrb.gmra.mxu2 %v2544_v31 }
  0xc9   :  { %574 = vmatpush.bf16.msra.mxu2 %v2607_v14  ;;  %588 = vmatpush.bf16.msra.mxu3 %v2602_v8 }
  0xcd   :  { %575 = vmatpush.bf16.msra.mxu2 %v2621_v23  ;;  %589 = vmatpush.bf16.msra.mxu3 %v2617_v19 }
  0xd1   :  { %576 = vmatpush.bf16.msra.mxu2 %v2629_v27  ;;  %590 = vmatpush.bf16.msra.mxu3 %v2626_v26 }
  0xd5   :  { %577 = vmatpush.bf16.msra.mxu2 %v2636_v30  ;;  %710 = vmatpush.bf16.msrb.mxu3 %v2684_v28 }
  0xd9   :  { %697 = vmatpush.bf16.msrb.mxu2 %v2681_v22  ;;  %711 = vmatpush.bf16.msrb.mxu3 %v2695_v48 }
  0xdd   :  { %698 = vmatpush.bf16.msrb.mxu2 %v2692_v43 }
 0x11d   :  { %v258_v59 = vpop.permute.xlu0 %257 }
 0x11e   :  { %v260_v60 = vmul.f32 %v258_v59, %v237_v58  ;;  %v2703_v58 = vor.u32 %v2250_v55, %v2122_v54  ;;  %v2124_v59 = vld [vmem:[#allocation2 + $0x18] sm:$0xf0]  ;;  %v2027_v54 = vld [vmem:[%s3156_s4 + $0x2] sm:$0x3] }
 0x11f   :  { %v2772_v55 = vperm.slane %v2027_v54, 1 }
 0x120   :  { %262 = vrot.lane.b32.xlu0 %v260_v60, %s2545_s21  ;;  %v2706_v60 = vor.u32 %v2249_v56, %v2124_v59  ;;  %481 = vmatpush.bf16.msra.mxu0 %v2703_v58 }
 0x121   :  { %699 = vmatpush.bf16.msrb.mxu2 %v2703_v58 }
 0x122   :  { %494 = vmatpush.bf16.msra.mxu1 %v2706_v60  ;;  %712 = vmatpush.bf16.msrb.mxu3 %v2706_v60 }
 0x147   :  { %v431_v29 = vpop.f32.mrf.mxu3 }
 0x14f   :  { %v433_v38 = vpop.f32.mrf.mxu3 }
 0x192   :  { %v263_v5 = vpop.permute.xlu0 %262 }
 0x193   :  { %v2669_v6 = vadd.f32 %v263_v5, %v255_v4  ;;  %v2713_v5 = vor.u32 %v2248_v62, %v2114_v61 }
 0x195   :  { %2276 = vtanh.f32 %v2669_v6  ;;  %482 = vmatpush.bf16.msra.mxu0 %v2713_v5  ;;  %700 = vmatpush.bf16.msrb.mxu2 %v2713_v5 }
 0x196   :  { %2278 = vpow2.f32 %v2075_v9 }
 0x19b   :  { %v2277_v7 = vpop.eup %2276 }
 0x19c   :  { %268 = vrot.lane.b32.xlu1 %v2277_v7, %s2545_s21  ;;  %v2279_v10 = vpop.eup %2278  ;;  %v2718_v7 = vor.u32 %v2247_v63, %v2116_v1 }
 0x19d   :  { %v2673_v11 = vadd.f32 1.0, %v2279_v10 }
 0x19e   :  { %495 = vmatpush.bf16.msra.mxu1 %v2718_v7  ;;  %713 = vmatpush.bf16.msrb.mxu3 %v2718_v7 }
 0x19f   :  { %2280 = vrcp.f32 %v2673_v11  ;;  %v250_v31 = vand.u32 2147483648, %v2673_v11  ;;  %vm244_vm6 = vweird.f32 %v2673_v11  ;;  %v248_v13 = vand.u32 2147483647, %v2673_v11 }
 0x1a1   :  { %v251_v17 = vor.u32 1.1754944e-38, %v250_v31  ;;  %vm249_vm8 = vcmp.eq.f32.partialorder %v248_v13, 8.507059e+37 }
 0x1a5   :  { %v2281_v57 = vpop.eup %2280 }
 0x1a6   :  { %v240_v4 = vmul.f32 %v2281_v57, %v2673_v11  ;;  %vm245_vm5 = vweird.f32 %v2281_v57  ;;  %v418_v11 = vpop.f32.mrf.mxu2 }
 0x1a7   :  { %vm246_vm7 = vmor %vm244_vm6, %vm245_vm5 }
 0x1a8   :  { %v241_v9 = vsub.f32 1.0, %v240_v4 }
 0x1aa   :  { %v242_v10 = vmul.f32 %v2281_v57, %v241_v9  ;;  %v2779_v9 = vperm.slane %v2027_v54, 0 }
 0x1ac   :  { %v243_v12 = vadd.f32 %v2281_v57, %v242_v10 }
 0x1ae   :  { %v247_v15 = vsel %vm246_vm7, %v2281_v57, %v243_v12  ;;  %v420_v39 = vpop.f32.mrf.mxu2 }
 0x1af   :  { %v252_v21 = vsel %vm249_vm8, %v251_v17, %v247_v15 }
 0x20e   :  { %v269_v20 = vpop.permute.xlu1 %268 }
 0x20f   :  { %v271_v24 = vmul.f32 %v269_v20, %v252_v21 }
 0x211   :  { %v272_v25 = vpack.c.bf16 %v271_v24, %v271_v24 }
 0x213   :  { %2076 = vmatmul.msk.bf16.vlgmr.msrb.gmra.mxu0 %vm184_vm9, %v272_v25  ;;  %2077 = vmatmul.msk.bf16.vlgmr.msrb.gmra.mxu1 %vm184_vm9, %v272_v25 }
 0x214   :  { %671 = vmatpush.bf16.msrb.mxu0 %v2663_v0  ;;  %684 = vmatpush.bf16.msrb.mxu1 %v2665_v2 }
 0x218   :  { %672 = vmatpush.bf16.msrb.mxu0 %v2675_v16  ;;  %685 = vmatpush.bf16.msrb.mxu1 %v2677_v18 }
 0x21c   :  { %673 = vmatpush.bf16.msrb.mxu0 %v2687_v37  ;;  %686 = vmatpush.bf16.msrb.mxu1 %v2690_v41 }
 0x220   :  { %674 = vmatpush.bf16.msrb.mxu0 %v2698_v52  ;;  %687 = vmatpush.bf16.msrb.mxu1 %v2700_v53 }
 0x223   :  { %2144 = vmatmul.msk.bf16.vlgmr.msra.gmra.mxu0 %vm184_vm9, %v272_v25  ;;  %2145 = vmatmul.msk.bf16.vlgmr.msra.gmra.mxu1 %vm184_vm9, %v272_v25 }
 0x224   :  { %800 = vmatpush.bf16.msra.mxu1 %v2593_v3  ;;  %787 = vmatpush.bf16.msra.mxu0 %v2607_v14 }
 0x228   :  { %801 = vmatpush.bf16.msra.mxu1 %v2602_v8  ;;  %788 = vmatpush.bf16.msra.mxu0 %v2621_v23 }
 0x22c   :  { %802 = vmatpush.bf16.msra.mxu1 %v2617_v19  ;;  %789 = vmatpush.bf16.msra.mxu0 %v2629_v27 }
 0x230   :  { %803 = vmatpush.bf16.msra.mxu1 %v2626_v26  ;;  %790 = vmatpush.bf16.msra.mxu0 %v2636_v30 }
 0x290   :  { %v285_v40 = vpop.f32.mrf.mxu0  ;;  %v298_v45 = vpop.f32.mrf.mxu1 }
 0x291   :  { %v305_v46 = vrot.slane %v298_v45, 6  ;;  %v304_v12 = vrot.slane %v285_v40, 6 }
 0x293   :  { %v2765_v47 = vadd.f32 %v305_v46, %v2652_v35  ;;  %v308_v13 = vadd.f32 %v304_v12, %v2659_v44 }
 0x295   :  { %2282 = vtanh.f32 %v2765_v47  ;;  %v2078_v15 = vmul.f32 -1.442695, %v308_v13 }
 0x298   :  { %v287_v49 = vpop.f32.mrf.mxu0  ;;  %v300_v50 = vpop.f32.mrf.mxu1 }
 0x29b   :  { %v2283_v51 = vpop.eup %2282 }
 0x29c   :  { %354 = vrot.lane.b32.xlu1 %v2283_v51, %s2545_s21 }
 0x2a0   :  { %v484_v56 = vpop.f32.mrf.mxu0  ;;  %v497_v57 = vpop.f32.mrf.mxu1 }
 0x2a1   :  { %v485_v59 = vadd.f32 %v484_v56, %v418_v11  ;;  %v498_v61 = vadd.f32 %v497_v57, %v431_v29 }
 0x2a3   :  { %v2775_v62 = vadd.f32 %v2772_v55, %v498_v61  ;;  %v506_v10 = vadd.f32 %v2779_v9, %v485_v59 }
 0x2a5   :  { %2284 = vtanh.f32 %v2775_v62  ;;  %v2146_v31 = vmul.f32 -1.442695, %v506_v10 }
 0x2a7   :  { %2286 = vpow2.f32 %v2146_v31 }
 0x2a8   :  { %v486_v63 = vpop.f32.mrf.mxu0  ;;  %v499_v1 = vpop.f32.mrf.mxu1  ;;  %2288 = vpow2.f32 %v2078_v15 }
 0x2ab   :  { %v2285_v4 = vpop.eup %2284 }
 0x2ac   :  { %549 = vrot.lane.b32.xlu2 %v2285_v4, %s2545_s21 }
 0x2ad   :  { %v2287_v17 = vpop.eup %2286 }
 0x2ae   :  { %v514_v20 = vadd.f32 1.0, %v2287_v17  ;;  %v2289_v21 = vpop.eup %2288  ;;  %v350_v17 = vrot.slane %v2669_v6, 6  ;;  %v2147_v6 = vmul.f32 -1.442695, %v2775_v62 }
 0x2af   :  { %v316_v24 = vadd.f32 1.0, %v2289_v21 }
 0x2b0   :  { %2290 = vrcp.f32 %v514_v20  ;;  %v527_v49 = vand.u32 2147483648, %v514_v20  ;;  %vm521_vm11 = vweird.f32 %v514_v20  ;;  %v525_v50 = vand.u32 2147483647, %v514_v20 }
 0x2b1   :  { %2292 = vrcp.f32 %v316_v24  ;;  %v329_v1 = vand.u32 2147483648, %v316_v24  ;;  %vm323_vm15 = vweird.f32 %v316_v24  ;;  %v327_v4 = vand.u32 2147483647, %v316_v24 }
 0x2b2   :  { %v528_v56 = vor.u32 1.1754944e-38, %v527_v49  ;;  %vm526_vm13 = vcmp.eq.f32.partialorder %v525_v50, 8.507059e+37 }
 0x2b3   :  { %v330_v12 = vor.u32 1.1754944e-38, %v329_v1  ;;  %vm328_vm1 = vcmp.eq.f32.partialorder %v327_v4, 8.507059e+37 }
 0x2b6   :  { %v2291_v25 = vpop.eup %2290 }
 0x2b7   :  { %v517_v11 = vmul.f32 %v2291_v25, %v514_v20  ;;  %v2293_v38 = vpop.eup %2292  ;;  %vm522_vm10 = vweird.f32 %v2291_v25 }
 0x2b8   :  { %v319_v45 = vmul.f32 %v2293_v38, %v316_v24  ;;  %vm523_vm12 = vmor %vm521_vm11, %vm522_vm10  ;;  %vm324_vm14 = vweird.f32 %v2293_v38 }
 0x2b9   :  { %v518_v29 = vsub.f32 1.0, %v517_v11  ;;  %vm325_vm0 = vmor %vm323_vm15, %vm324_vm14 }
 0x2ba   :  { %v320_v40 = vsub.f32 1.0, %v319_v45  ;;  %v2079_v45 = vmul.f32 -1.442695, %v2765_v47 }
 0x2bb   :  { %v519_v39 = vmul.f32 %v2291_v25, %v518_v29 }
 0x2bc   :  { %v321_v54 = vmul.f32 %v2293_v38, %v320_v40 }
 0x2bd   :  { %v520_v46 = vadd.f32 %v2291_v25, %v519_v39 }
 0x2be   :  { %v322_v63 = vadd.f32 %v2293_v38, %v321_v54 }
 0x2bf   :  { %v524_v51 = vsel %vm523_vm12, %v2291_v25, %v520_v46 }
 0x2c0   :  { %v529_v57 = vsel %vm526_vm13, %v528_v56, %v524_v51  ;;  %v326_v10 = vsel %vm325_vm0, %v2293_v38, %v322_v63 }
 0x2c1   :  { %v331_v13 = vsel %vm328_vm1, %v330_v12, %v326_v10  ;;  %v547_v24 = vmul.f32 0.0, %v529_v57 }
 0x2c2   :  { %v352_v20 = vmul.f32 %v350_v17, %v331_v13 }
 0x306   :  { %v550_v59 = vpop.permute.xlu2 %549 }
 0x307   :  { %v552_v61 = vmul.f32 %v550_v59, %v529_v57 }
 0x309   :  { %554 = vrot.lane.b32.xlu0 %v552_v61, %s2545_s21 }
 0x30e   :  { %v355_v31 = vpop.permute.xlu1 %354 }
 0x30f   :  { %v357_v15 = vmul.f32 %v355_v31, %v331_v13 }
 0x311   :  { %359 = vrot.lane.b32.xlu2 %v357_v15, %s2545_s21 }
 0x36b   :  { %v360_v21 = vpop.permute.xlu2 %359 }
 0x36c   :  { %v2786_v25 = vadd.f32 %v360_v21, %v352_v20 }
 0x36e   :  { %2294 = vtanh.f32 %v2786_v25 }
 0x374   :  { %v2295_v11 = vpop.eup %2294 }
 0x375   :  { %365 = vrot.lane.b32.xlu1 %v2295_v11, %s2545_s21 }
 0x37b   :  { %v555_v29 = vpop.permute.xlu0 %554 }
 0x37c   :  { %v2790_v38 = vadd.f32 %v555_v29, %v547_v24 }
 0x37e   :  { %2296 = vtanh.f32 %v2790_v38 }
 0x37f   :  { %2298 = vpow2.f32 %v2147_v6 }
 0x380   :  { %2300 = vpow2.f32 %v2079_v45 }
 0x384   :  { %v2297_v39 = vpop.eup %2296 }
 0x385   :  { %560 = vrot.lane.b32.xlu2 %v2297_v39, %s2545_s21  ;;  %v2299_v46 = vpop.eup %2298 }
 0x386   :  { %v515_v40 = vadd.f32 1.0, %v2299_v46  ;;  %v2301_v49 = vpop.eup %2300 }
 0x387   :  { %v317_v50 = vadd.f32 1.0, %v2301_v49 }
 0x388   :  { %2302 = vrcp.f32 %v515_v40  ;;  %v542_v62 = vand.u32 2147483648, %v515_v40  ;;  %vm536_vm3 = vweird.f32 %v515_v40  ;;  %v540_v4 = vand.u32 2147483647, %v515_v40 }
 0x389   :  { %2304 = vrcp.f32 %v317_v50  ;;  %v344_v20 = vand.u32 2147483648, %v317_v50  ;;  %vm338_vm7 = vweird.f32 %v317_v50  ;;  %v342_v11 = vand.u32 2147483647, %v317_v50 }
 0x38a   :  { %v543_v12 = vor.u32 1.1754944e-38, %v542_v62  ;;  %vm541_vm5 = vcmp.eq.f32.partialorder %v540_v4, 8.507059e+37 }
 0x38b   :  { %v345_v29 = vor.u32 1.1754944e-38, %v344_v20  ;;  %vm343_vm10 = vcmp.eq.f32.partialorder %v342_v11, 8.507059e+37 }
 0x38e   :  { %v2303_v51 = vpop.eup %2302 }
 0x38f   :  { %v532_v54 = vmul.f32 %v2303_v51, %v515_v40  ;;  %v2305_v57 = vpop.eup %2304  ;;  %vm537_vm2 = vweird.f32 %v2303_v51 }
 0x390   :  { %v334_v61 = vmul.f32 %v2305_v57, %v317_v50  ;;  %vm538_vm4 = vmor %vm536_vm3, %vm537_vm2  ;;  %vm339_vm6 = vweird.f32 %v2305_v57 }
 0x391   :  { %v533_v56 = vsub.f32 1.0, %v532_v54  ;;  %vm340_vm8 = vmor %vm338_vm7, %vm339_vm6 }
 0x392   :  { %v335_v1 = vsub.f32 1.0, %v334_v61 }
 0x393   :  { %v534_v59 = vmul.f32 %v2303_v51, %v533_v56 }
 0x394   :  { %v336_v10 = vmul.f32 %v2305_v57, %v335_v1 }
 0x395   :  { %v535_v63 = vadd.f32 %v2303_v51, %v534_v59 }
 0x396   :  { %v337_v17 = vadd.f32 %v2305_v57, %v336_v10 }
 0x397   :  { %v539_v47 = vsel %vm538_vm4, %v2303_v51, %v535_v63 }
 0x398   :  { %v544_v13 = vsel %vm541_vm5, %v543_v12, %v539_v47  ;;  %v341_v24 = vsel %vm340_vm8, %v2305_v57, %v337_v17 }
 0x399   :  { %v346_v39 = vsel %vm343_vm10, %v345_v29, %v341_v24 }
 0x3df   :  { %v561_v31 = vpop.permute.xlu2 %560 }
 0x3e0   :  { %v563_v15 = vmul.f32 %v561_v31, %v544_v13 }
 0x3e2   :  { %v663_v21 = vpack.c.bf16 %v563_v15, %v563_v15 }
 0x3e4   :  { %2152 = vmatmul.msk.bf16.vlgmr.msrb.gmra.mxu0 %vm184_vm9, %v663_v21  ;;  %2153 = vmatmul.msk.bf16.vlgmr.msrb.gmra.mxu1 %vm184_vm9, %v663_v21 }
 0x3e5   :  { %910 = vmatpush.bf16.msrb.mxu0 %v2681_v22  ;;  %923 = vmatpush.bf16.msrb.mxu1 %v2684_v28 }
 0x3e7   :  { %v366_v6 = vpop.permute.xlu1 %365 }
 0x3e8   :  { %v368_v45 = vmul.f32 %v366_v6, %v346_v39 }
 0x3e9   :  { %911 = vmatpush.bf16.msrb.mxu0 %v2692_v43  ;;  %924 = vmatpush.bf16.msrb.mxu1 %v2695_v48 }
 0x3ea   :  { %v564_v46 = vpack.c.bf16 %v368_v45, %v368_v45 }
 0x3ec   :  { %v566_v40 = vrot.slane %v564_v46, 1 }
 0x3ed   :  { %912 = vmatpush.bf16.msrb.mxu0 %v2703_v58  ;;  %925 = vmatpush.bf16.msrb.mxu1 %v2706_v60 }
 0x3ee   :  { %2148 = vmatmul.msk.bf16.vlgmr.msra.gmra.mxu2 %vm184_vm9, %v566_v40  ;;  %2149 = vmatmul.msk.bf16.vlgmr.msra.gmra.mxu3 %vm184_vm9, %v566_v40 }
 0x3ef   :  { %884 = vmatpush.bf16.msra.mxu2 %v2663_v0  ;;  %897 = vmatpush.bf16.msra.mxu3 %v2665_v2 }
 0x3f1   :  { %913 = vmatpush.bf16.msrb.mxu0 %v2713_v5  ;;  %926 = vmatpush.bf16.msrb.mxu1 %v2718_v7 }
 0x3f3   :  { %885 = vmatpush.bf16.msra.mxu2 %v2675_v16  ;;  %898 = vmatpush.bf16.msra.mxu3 %v2677_v18 }
 0x3f7   :  { %886 = vmatpush.bf16.msra.mxu2 %v2687_v37  ;;  %899 = vmatpush.bf16.msra.mxu3 %v2690_v41 }
 0x3fb   :  { %887 = vmatpush.bf16.msra.mxu2 %v2698_v52  ;;  %900 = vmatpush.bf16.msra.mxu3 %v2700_v53 }
 0x3fe   :  { %2154 = vmatmul.msk.bf16.vlgmr.msrb.gmra.mxu2 %vm184_vm9, %v566_v40  ;;  %2155 = vmatmul.msk.bf16.vlgmr.msrb.gmra.mxu3 %vm184_vm9, %v566_v40 }
 0x3ff   :  { %1013 = vmatpush.bf16.msrb.mxu3 %v2593_v3  ;;  %1000 = vmatpush.bf16.msrb.mxu2 %v2607_v14 }
 0x403   :  { %1014 = vmatpush.bf16.msrb.mxu3 %v2602_v8  ;;  %1001 = vmatpush.bf16.msrb.mxu2 %v2621_v23 }
 0x407   :  { %1015 = vmatpush.bf16.msrb.mxu3 %v2617_v19  ;;  %1002 = vmatpush.bf16.msrb.mxu2 %v2629_v27 }
 0x40b   :  { %1016 = vmatpush.bf16.msrb.mxu3 %v2626_v26  ;;  %1003 = vmatpush.bf16.msrb.mxu2 %v2636_v30 }
 0x461   :  { %v676_v49 = vpop.f32.mrf.mxu0  ;;  %v689_v50 = vpop.f32.mrf.mxu1 }
 0x469   :  { %v678_v51 = vpop.f32.mrf.mxu0  ;;  %v691_v54 = vpop.f32.mrf.mxu1 }
 0x471   :  { %v579_v56 = vpop.f32.mrf.mxu2  ;;  %v592_v57 = vpop.f32.mrf.mxu3 }
 0x472   :  { %v599_v59 = vrot.slane %v592_v57, 4  ;;  %v598_v20 = vrot.slane %v579_v56, 4 }
 0x474   :  { %v2827_v61 = vadd.f32 %v599_v59, %v2652_v35  ;;  %v602_v21 = vadd.f32 %v598_v20, %v2659_v44 }
 0x476   :  { %2306 = vtanh.f32 %v2827_v61  ;;  %v2150_v11 = vmul.f32 -1.442695, %v602_v21 }
 0x479   :  { %v581_v63 = vpop.f32.mrf.mxu2  ;;  %v594_v1 = vpop.f32.mrf.mxu3 }
 0x47c   :  { %v2307_v62 = vpop.eup %2306 }
 0x47d   :  { %648 = vrot.lane.b32.xlu0 %v2307_v62, %s2545_s21 }
 0x481   :  { %v702_v4 = vpop.f32.mrf.mxu2  ;;  %v715_v47 = vpop.f32.mrf.mxu3 }
 0x482   :  { %v703_v10 = vadd.f32 %v702_v4, %v676_v49  ;;  %v716_v12 = vadd.f32 %v715_v47, %v689_v50 }
 0x484   :  { %v2832_v31 = vadd.f32 %v716_v12, %v2772_v55  ;;  %v719_v29 = vadd.f32 %v703_v10, %v2779_v9 }
 0x486   :  { %2308 = vtanh.f32 %v2832_v31  ;;  %v2156_v6 = vmul.f32 -1.442695, %v719_v29 }
 0x487   :  { %2310 = vpow2.f32 %v2150_v11 }
 0x489   :  { %v704_v13 = vpop.f32.mrf.mxu2  ;;  %v717_v15 = vpop.f32.mrf.mxu3 }
 0x48c   :  { %v2309_v17 = vpop.eup %2308 }
 0x48d   :  { %762 = vrot.lane.b32.xlu1 %v2309_v17, %s2545_s21  ;;  %v2311_v24 = vpop.eup %2310 }
 0x48e   :  { %v610_v39 = vadd.f32 1.0, %v2311_v24 }
 0x490   :  { %2312 = vrcp.f32 %v610_v39  ;;  %v623_v57 = vand.u32 2147483648, %v610_v39  ;;  %vm617_vm12 = vweird.f32 %v610_v39  ;;  %v621_v59 = vand.u32 2147483647, %v610_v39 }
 0x491   :  { %2314 = vpow2.f32 %v2156_v6  ;;  %v644_v6 = vrot.slane %v2786_v25, 6  ;;  %v2151_v25 = vmul.f32 -1.442695, %v2827_v61 }
 0x492   :  { %v624_v62 = vor.u32 1.1754944e-38, %v623_v57  ;;  %vm622_vm14 = vcmp.eq.f32.partialorder %v621_v59, 8.507059e+37 }
 0x496   :  { %v2313_v45 = vpop.eup %2312 }
 0x497   :  { %v2315_v46 = vpop.eup %2314  ;;  %v613_v40 = vmul.f32 %v2313_v45, %v610_v39  ;;  %vm618_vm11 = vweird.f32 %v2313_v45 }
 0x498   :  { %v727_v49 = vadd.f32 1.0, %v2315_v46  ;;  %vm619_vm13 = vmor %vm617_vm12, %vm618_vm11 }
 0x499   :  { %v614_v50 = vsub.f32 1.0, %v613_v40 }
 0x49a   :  { %2316 = vrcp.f32 %v727_v49  ;;  %v740_v17 = vand.u32 2147483648, %v727_v49  ;;  %vm734_vm0 = vweird.f32 %v727_v49  ;;  %v738_v20 = vand.u32 2147483647, %v727_v49 }
 0x49b   :  { %v615_v51 = vmul.f32 %v2313_v45, %v614_v50 }
 0x49c   :  { %v741_v11 = vor.u32 1.1754944e-38, %v740_v17  ;;  %vm739_vm2 = vcmp.eq.f32.partialorder %v738_v20, 8.507059e+37 }
 0x49d   :  { %v616_v54 = vadd.f32 %v2313_v45, %v615_v51 }
 0x49f   :  { %v620_v63 = vsel %vm619_vm13, %v2313_v45, %v616_v54 }
 0x4a0   :  { %v2317_v56 = vpop.eup %2316  ;;  %v625_v4 = vsel %vm622_vm14, %v624_v62, %v620_v63  ;;  %v2157_v63 = vmul.f32 -1.442695, %v2832_v31 }
 0x4a1   :  { %v730_v1 = vmul.f32 %v2317_v56, %v727_v49  ;;  %vm735_vm15 = vweird.f32 %v2317_v56  ;;  %v646_v45 = vmul.f32 %v644_v6, %v625_v4 }
 0x4a2   :  { %vm736_vm1 = vmor %vm734_vm0, %vm735_vm15 }
 0x4a3   :  { %v731_v12 = vsub.f32 1.0, %v730_v1 }
 0x4a5   :  { %v732_v13 = vmul.f32 %v2317_v56, %v731_v12 }
 0x4a7   :  { %v733_v15 = vadd.f32 %v2317_v56, %v732_v13 }
 0x4a9   :  { %v737_v21 = vsel %vm736_vm1, %v2317_v56, %v733_v15 }
 0x4aa   :  { %v742_v24 = vsel %vm739_vm2, %v741_v11, %v737_v21 }
 0x4ab   :  { %v760_v49 = vmul.f32 %v742_v24, %v2790_v38 }
 0x4ef   :  { %v649_v47 = vpop.permute.xlu0 %648 }
 0x4f0   :  { %v651_v10 = vmul.f32 %v649_v47, %v625_v4 }
 0x4f2   :  { %653 = vrot.lane.b32.xlu2 %v651_v10, %s2545_s21 }
 0x4ff   :  { %v763_v29 = vpop.permute.xlu1 %762 }
 0x500   :  { %v765_v39 = vmul.f32 %v763_v29, %v742_v24 }
 0x502   :  { %767 = vrot.lane.b32.xlu0 %v765_v39, %s2545_s21 }
 0x54c   :  { %v654_v46 = vpop.permute.xlu2 %653 }
 0x54d   :  { %v2841_v40 = vadd.f32 %v654_v46, %v646_v45 }
 0x54f   :  { %2318 = vtanh.f32 %v2841_v40 }
 0x555   :  { %v2319_v50 = vpop.eup %2318 }
 0x556   :  { %659 = vrot.lane.b32.xlu1 %v2319_v50, %s2545_s21 }
 0x574   :  { %v768_v51 = vpop.permute.xlu0 %767 }
 0x575   :  { %v2846_v54 = vadd.f32 %v768_v51, %v760_v49 }
 0x577   :  { %2320 = vtanh.f32 %v2846_v54 }
 0x578   :  { %2322 = vpow2.f32 %v2151_v25 }
 0x57d   :  { %v2321_v56 = vpop.eup %2320 }
 0x57e   :  { %773 = vrot.lane.b32.xlu2 %v2321_v56, %s2545_s21  ;;  %v2323_v57 = vpop.eup %2322 }
 0x57f   :  { %v611_v59 = vadd.f32 1.0, %v2323_v57 }
 0x581   :  { %2324 = vrcp.f32 %v611_v59  ;;  %v638_v15 = vand.u32 2147483648, %v611_v59  ;;  %vm632_vm4 = vweird.f32 %v611_v59  ;;  %v636_v61 = vand.u32 2147483647, %v611_v59 }
 0x582   :  { %2326 = vpow2.f32 %v2157_v63 }
 0x583   :  { %v639_v21 = vor.u32 1.1754944e-38, %v638_v15  ;;  %vm637_vm6 = vcmp.eq.f32.partialorder %v636_v61, 8.507059e+37 }
 0x587   :  { %v2325_v1 = vpop.eup %2324 }
 0x588   :  { %v2327_v62 = vpop.eup %2326  ;;  %v628_v38 = vmul.f32 %v2325_v1, %v611_v59  ;;  %vm633_vm3 = vweird.f32 %v2325_v1 }
 0x589   :  { %v728_v4 = vadd.f32 1.0, %v2327_v62  ;;  %vm634_vm5 = vmor %vm632_vm4, %vm633_vm3 }
 0x58a   :  { %v629_v47 = vsub.f32 1.0, %v628_v38 }
 0x58b   :  { %2328 = vrcp.f32 %v728_v4  ;;  %v755_v50 = vand.u32 2147483648, %v728_v4  ;;  %vm749_vm8 = vweird.f32 %v728_v4  ;;  %v753_v49 = vand.u32 2147483647, %v728_v4 }
 0x58c   :  { %v630_v10 = vmul.f32 %v2325_v1, %v629_v47 }
 0x58d   :  { %v756_v56 = vor.u32 1.1754944e-38, %v755_v50  ;;  %vm754_vm11 = vcmp.eq.f32.partialorder %v753_v49, 8.507059e+37 }
 0x58e   :  { %v631_v12 = vadd.f32 %v2325_v1, %v630_v10 }
 0x590   :  { %v635_v17 = vsel %vm634_vm5, %v2325_v1, %v631_v12 }
 0x591   :  { %v2329_v13 = vpop.eup %2328  ;;  %v640_v31 = vsel %vm637_vm6, %v639_v21, %v635_v17 }
 0x592   :  { %v745_v20 = vmul.f32 %v2329_v13, %v728_v4  ;;  %vm750_vm7 = vweird.f32 %v2329_v13 }
 0x593   :  { %vm751_vm10 = vmor %vm749_vm8, %vm750_vm7 }
 0x594   :  { %v746_v29 = vsub.f32 1.0, %v745_v20 }
 0x596   :  { %v747_v45 = vmul.f32 %v2329_v13, %v746_v29 }
 0x598   :  { %v748_v46 = vadd.f32 %v2329_v13, %v747_v45 }
 0x59a   :  { %v752_v51 = vsel %vm751_vm10, %v2329_v13, %v748_v46 }
 0x59b   :  { %v757_v57 = vsel %vm754_vm11, %v756_v56, %v752_v51 }
 0x5c8   :  { %v660_v11 = vpop.permute.xlu1 %659 }
 0x5c9   :  { %v662_v24 = vmul.f32 %v660_v11, %v640_v31 }
 0x5cb   :  { %v777_v39 = vpack.c.bf16 %v662_v24, %v662_v24 }
 0x5cd   :  { %v779_v6 = vrot.slane %v777_v39, 2 }
 0x5cf   :  { %2158 = vmatmul.msk.bf16.vlgmr.msra.gmra.mxu0 %vm184_vm9, %v779_v6  ;;  %2159 = vmatmul.msk.bf16.vlgmr.msra.gmra.mxu1 %vm184_vm9, %v779_v6 }
 0x5d0   :  { %1091 = vmatpush.bf16.msra.mxu0 %v2663_v0  ;;  %1104 = vmatpush.bf16.msra.mxu1 %v2665_v2 }
 0x5d4   :  { %1092 = vmatpush.bf16.msra.mxu0 %v2675_v16  ;;  %1105 = vmatpush.bf16.msra.mxu1 %v2677_v18 }
 0x5d8   :  { %v774_v25 = vpop.permute.xlu2 %773  ;;  %1093 = vmatpush.bf16.msra.mxu0 %v2687_v37  ;;  %1106 = vmatpush.bf16.msra.mxu1 %v2690_v41 }
 0x5d9   :  { %v776_v59 = vmul.f32 %v774_v25, %v757_v57 }
 0x5db   :  { %v876_v63 = vpack.c.bf16 %v776_v59, %v776_v59 }
 0x5dc   :  { %1094 = vmatpush.bf16.msra.mxu0 %v2698_v52  ;;  %1107 = vmatpush.bf16.msra.mxu1 %v2700_v53 }
 0x5dd   :  { %2162 = vmatmul.msk.bf16.vlgmr.msra.gmra.mxu2 %vm184_vm9, %v876_v63  ;;  %2163 = vmatmul.msk.bf16.vlgmr.msra.gmra.mxu3 %vm184_vm9, %v876_v63 }
 0x5de   :  { %1130 = vmatpush.bf16.msra.mxu3 %v2684_v28  ;;  %1117 = vmatpush.bf16.msra.mxu2 %v2681_v22 }
 0x5df   :  { %2164 = vmatmul.msk.bf16.vlgmr.msrb.gmra.mxu0 %vm184_vm9, %v779_v6  ;;  %2165 = vmatmul.msk.bf16.vlgmr.msrb.gmra.mxu1 %vm184_vm9, %v779_v6 }
 0x5e0   :  { %1218 = vmatpush.bf16.msrb.mxu1 %v2593_v3  ;;  %1205 = vmatpush.bf16.msrb.mxu0 %v2607_v14 }
 0x5e2   :  { %1131 = vmatpush.bf16.msra.mxu3 %v2695_v48  ;;  %1118 = vmatpush.bf16.msra.mxu2 %v2692_v43 }
 0x5e4   :  { %1219 = vmatpush.bf16.msrb.mxu1 %v2602_v8  ;;  %1206 = vmatpush.bf16.msrb.mxu0 %v2621_v23 }
 0x5e6   :  { %1132 = vmatpush.bf16.msra.mxu3 %v2706_v60  ;;  %1119 = vmatpush.bf16.msra.mxu2 %v2703_v58 }
 0x5e8   :  { %1220 = vmatpush.bf16.msrb.mxu1 %v2617_v19  ;;  %1207 = vmatpush.bf16.msrb.mxu0 %v2629_v27 }
 0x5ea   :  { %1133 = vmatpush.bf16.msra.mxu3 %v2718_v7  ;;  %1120 = vmatpush.bf16.msra.mxu2 %v2713_v5 }
 0x5ec   :  { %1221 = vmatpush.bf16.msrb.mxu1 %v2626_v26  ;;  %1208 = vmatpush.bf16.msrb.mxu0 %v2636_v30 }
 0x64c   :  { %v792_v1 = vpop.f32.mrf.mxu0  ;;  %v805_v62 = vpop.f32.mrf.mxu1 }
 0x64d   :  { %v812_v38 = vrot.slane %v805_v62, 2  ;;  %v811_v6 = vrot.slane %v792_v1, 2 }
 0x64f   :  { %v2883_v4 = vadd.f32 %v812_v38, %v2652_v35  ;;  %v815_v45 = vadd.f32 %v811_v6, %v2659_v44 }
 0x651   :  { %2330 = vtanh.f32 %v2883_v4  ;;  %v2160_v46 = vmul.f32 -1.442695, %v815_v45 }
 0x654   :  { %v794_v47 = vpop.f32.mrf.mxu0  ;;  %v807_v10 = vpop.f32.mrf.mxu1 }
 0x657   :  { %v2331_v12 = vpop.eup %2330 }
 0x658   :  { %861 = vrot.lane.b32.xlu0 %v2331_v12, %s2545_s21 }
 0x65c   :  { %v915_v13 = vpop.f32.mrf.mxu0  ;;  %v928_v15 = vpop.f32.mrf.mxu1 }
 0x660   :  { %v889_v61 = vpop.f32.mrf.mxu2  ;;  %v902_v17 = vpop.f32.mrf.mxu3 }
 0x661   :  { %v916_v20 = vadd.f32 %v915_v13, %v889_v61  ;;  %v929_v21 = vadd.f32 %v928_v15, %v902_v17 }
 0x663   :  { %v2888_v31 = vadd.f32 %v929_v21, %v2772_v55  ;;  %v932_v51 = vadd.f32 %v916_v20, %v2779_v9 }
 0x664   :  { %v917_v11 = vpop.f32.mrf.mxu0  ;;  %v930_v24 = vpop.f32.mrf.mxu1 }
 0x665   :  { %2332 = vtanh.f32 %v2888_v31  ;;  %v2166_v56 = vmul.f32 -1.442695, %v932_v51 }
 0x666   :  { %2334 = vpow2.f32 %v2160_v46 }
 0x668   :  { %v891_v35 = vpop.f32.mrf.mxu2  ;;  %v904_v29 = vpop.f32.mrf.mxu3 }
 0x66b   :  { %v2333_v39 = vpop.eup %2332 }
 0x66c   :  { %975 = vrot.lane.b32.xlu1 %v2333_v39, %s2545_s21  ;;  %v2335_v50 = vpop.eup %2334 }
 0x66d   :  { %v823_v49 = vadd.f32 1.0, %v2335_v50 }
 0x66f   :  { %2336 = vrcp.f32 %v823_v49  ;;  %v836_v1 = vand.u32 2147483648, %v823_v49  ;;  %vm830_vm13 = vweird.f32 %v823_v49  ;;  %v834_v44 = vand.u32 2147483647, %v823_v49 }
 0x670   :  { %2338 = vpow2.f32 %v2166_v56 }
 0x671   :  { %v837_v13 = vor.u32 1.1754944e-38, %v836_v1  ;;  %vm835_vm15 = vcmp.eq.f32.partialorder %v834_v44, 8.507059e+37  ;;  %v2167_v44 = vmul.f32 -1.442695, %v2888_v31 }
 0x675   :  { %v2337_v25 = vpop.eup %2336 }
 0x676   :  { %v826_v57 = vmul.f32 %v2337_v25, %v823_v49  ;;  %v2339_v59 = vpop.eup %2338  ;;  %vm831_vm12 = vweird.f32 %v2337_v25  ;;  %v857_v49 = vrot.slane %v2841_v40, 6  ;;  %v2161_v40 = vmul.f32 -1.442695, %v2883_v4 }
 0x677   :  { %v940_v62 = vadd.f32 1.0, %v2339_v59  ;;  %vm832_vm14 = vmor %vm830_vm13, %vm831_vm12 }
 0x678   :  { %v827_v63 = vsub.f32 1.0, %v826_v57 }
 0x679   :  { %2340 = vrcp.f32 %v940_v62  ;;  %v953_v35 = vand.u32 2147483648, %v940_v62  ;;  %vm947_vm1 = vweird.f32 %v940_v62  ;;  %v951_v29 = vand.u32 2147483647, %v940_v62 }
 0x67a   :  { %v828_v38 = vmul.f32 %v2337_v25, %v827_v63 }
 0x67b   :  { %v954_v6 = vor.u32 1.1754944e-38, %v953_v35  ;;  %vm952_vm3 = vcmp.eq.f32.partialorder %v951_v29, 8.507059e+37 }
 0x67c   :  { %v829_v47 = vadd.f32 %v2337_v25, %v828_v38 }
 0x67e   :  { %v833_v10 = vsel %vm832_vm14, %v2337_v25, %v829_v47 }
 0x67f   :  { %v2341_v12 = vpop.eup %2340  ;;  %v838_v61 = vsel %vm835_vm15, %v837_v13, %v833_v10 }
 0x680   :  { %v943_v20 = vmul.f32 %v2341_v12, %v940_v62  ;;  %vm948_vm0 = vweird.f32 %v2341_v12  ;;  %v859_v51 = vmul.f32 %v857_v49, %v838_v61 }
 0x681   :  { %vm949_vm2 = vmor %vm947_vm1, %vm948_vm0 }
 0x682   :  { %v944_v21 = vsub.f32 1.0, %v943_v20 }
 0x684   :  { %v945_v11 = vmul.f32 %v2341_v12, %v944_v21 }
 0x686   :  { %v946_v24 = vadd.f32 %v2341_v12, %v945_v11 }
 0x688   :  { %v950_v39 = vsel %vm949_vm2, %v2341_v12, %v946_v24 }
 0x689   :  { %v955_v46 = vsel %vm952_vm3, %v954_v6, %v950_v39 }
 0x68a   :  { %v973_v59 = vmul.f32 %v955_v46, %v2846_v54 }
 0x6ca   :  { %v862_v15 = vpop.permute.xlu0 %861 }
 0x6cb   :  { %v864_v17 = vmul.f32 %v862_v15, %v838_v61 }
 0x6cd   :  { %866 = vrot.lane.b32.xlu2 %v864_v17, %s2545_s21 }
 0x6de   :  { %v976_v45 = vpop.permute.xlu1 %975 }
 0x6df   :  { %v978_v50 = vmul.f32 %v976_v45, %v955_v46 }
 0x6e1   :  { %980 = vrot.lane.b32.xlu0 %v978_v50, %s2545_s21 }
 0x727   :  { %v867_v56 = vpop.permute.xlu2 %866 }
 0x728   :  { %v2897_v25 = vadd.f32 %v867_v56, %v859_v51 }
 0x72a   :  { %2342 = vtanh.f32 %v2897_v25 }
 0x730   :  { %v2343_v57 = vpop.eup %2342 }
 0x731   :  { %872 = vrot.lane.b32.xlu1 %v2343_v57, %s2545_s21 }
 0x753   :  { %v981_v63 = vpop.permute.xlu0 %980 }
 0x754   :  { %v2902_v62 = vadd.f32 %v981_v63, %v973_v59 }
 0x756   :  { %2344 = vtanh.f32 %v2902_v62 }
 0x757   :  { %2346 = vpow2.f32 %v2161_v40 }
 0x75c   :  { %v2345_v38 = vpop.eup %2344 }
 0x75d   :  { %986 = vrot.lane.b32.xlu2 %v2345_v38, %s2545_s21  ;;  %v2347_v47 = vpop.eup %2346 }
 0x75e   :  { %v824_v1 = vadd.f32 1.0, %v2347_v47 }
 0x760   :  { %2348 = vrcp.f32 %v824_v1  ;;  %v851_v20 = vand.u32 2147483648, %v824_v1  ;;  %vm845_vm5 = vweird.f32 %v824_v1  ;;  %v849_v21 = vand.u32 2147483647, %v824_v1 }
 0x761   :  { %2350 = vpow2.f32 %v2167_v44 }
 0x762   :  { %v852_v24 = vor.u32 1.1754944e-38, %v851_v20  ;;  %vm850_vm7 = vcmp.eq.f32.partialorder %v849_v21, 8.507059e+37 }
 0x766   :  { %v2349_v10 = vpop.eup %2348 }
 0x767   :  { %v841_v12 = vmul.f32 %v2349_v10, %v824_v1  ;;  %v2351_v54 = vpop.eup %2350  ;;  %vm846_vm4 = vweird.f32 %v2349_v10  ;;  %v2941_v1 = vadd.f32 %v2760_v34, %v94_v33 }
 0x768   :  { %v941_v15 = vadd.f32 1.0, %v2351_v54  ;;  %vm847_vm6 = vmor %vm845_vm5, %vm846_vm4 }
 0x769   :  { %v842_v13 = vsub.f32 1.0, %v841_v12 }
 0x76a   :  { %2352 = vrcp.f32 %v941_v15  ;;  %v968_v51 = vand.u32 2147483648, %v941_v15  ;;  %vm962_vm10 = vweird.f32 %v941_v15  ;;  %v966_v56 = vand.u32 2147483647, %v941_v15 }
 0x76b   :  { %v843_v61 = vmul.f32 %v2349_v10, %v842_v13 }
 0x76c   :  { %v969_v59 = vor.u32 1.1754944e-38, %v968_v51  ;;  %vm967_vm12 = vcmp.eq.f32.partialorder %v966_v56, 8.507059e+37 }
 0x76d   :  { %v844_v17 = vadd.f32 %v2349_v10, %v843_v61 }
 0x76f   :  { %v848_v4 = vsel %vm847_vm6, %v2349_v10, %v844_v17 }
 0x770   :  { %v2353_v11 = vpop.eup %2352  ;;  %v853_v35 = vsel %vm850_vm7, %v852_v24, %v848_v4 }
 0x771   :  { %v958_v39 = vmul.f32 %v2353_v11, %v941_v15  ;;  %vm963_vm8 = vweird.f32 %v2353_v11 }
 0x772   :  { %vm964_vm11 = vmor %vm962_vm10, %vm963_vm8 }
 0x773   :  { %v959_v46 = vsub.f32 1.0, %v958_v39  ;;  %v2956_v39 = vadd.f32 %v2762_v36, %v93_v42 }
 0x775   :  { %v960_v50 = vmul.f32 %v2353_v11, %v959_v46 }
 0x777   :  { %v961_v49 = vadd.f32 %v2353_v11, %v960_v50 }
 0x779   :  { %v965_v57 = vsel %vm964_vm11, %v2353_v11, %v961_v49 }
 0x77a   :  { %v970_v63 = vsel %vm967_vm12, %v969_v59, %v965_v57 }
 0x7a3   :  { %v873_v31 = vpop.permute.xlu1 %872 }
 0x7a4   :  { %v875_v29 = vmul.f32 %v873_v31, %v853_v35 }
 0x7a6   :  { %v990_v6 = vpack.c.bf16 %v875_v29, %v875_v29 }
 0x7a8   :  { %v992_v45 = vrot.slane %v990_v6, 3 }
 0x7aa   :  { %2168 = vmatmul.msk.bf16.vlgmr.msrb.gmra.mxu2 %vm184_vm9, %v992_v45  ;;  %2169 = vmatmul.msk.bf16.vlgmr.msrb.gmra.mxu3 %vm184_vm9, %v992_v45 }
 0x7ab   :  { %1315 = vmatpush.bf16.msrb.mxu3 %v2665_v2  ;;  %1302 = vmatpush.bf16.msrb.mxu2 %v2663_v0 }
 0x7af   :  { %1316 = vmatpush.bf16.msrb.mxu3 %v2677_v18  ;;  %1303 = vmatpush.bf16.msrb.mxu2 %v2675_v16 }
 0x7b3   :  { %1317 = vmatpush.bf16.msrb.mxu3 %v2690_v41  ;;  %1304 = vmatpush.bf16.msrb.mxu2 %v2687_v37 }
 0x7b7   :  { %v987_v38 = vpop.permute.xlu2 %986  ;;  %1318 = vmatpush.bf16.msrb.mxu3 %v2700_v53  ;;  %1305 = vmatpush.bf16.msrb.mxu2 %v2698_v52 }
 0x7b8   :  { %v989_v40 = vmul.f32 %v987_v38, %v970_v63 }
 0x7ba   :  { %v1083_v47 = vpack.c.bf16 %v989_v40, %v989_v40  ;;  %2174 = vmatmul.msk.bf16.vlgmr.msra.gmra.mxu2 %vm184_vm9, %v992_v45  ;;  %2175 = vmatmul.msk.bf16.vlgmr.msra.gmra.mxu3 %vm184_vm9, %v992_v45 }
 0x7bb   :  { %1431 = vmatpush.bf16.msra.mxu3 %v2593_v3  ;;  %1418 = vmatpush.bf16.msra.mxu2 %v2607_v14 }
 0x7bc   :  { %2172 = vmatmul.msk.bf16.vlgmr.msra.gmra.mxu0 %vm184_vm9, %v1083_v47  ;;  %2173 = vmatmul.msk.bf16.vlgmr.msra.gmra.mxu1 %vm184_vm9, %v1083_v47 }
 0x7bd   :  { %1328 = vmatpush.bf16.msra.mxu0 %v2681_v22  ;;  %1341 = vmatpush.bf16.msra.mxu1 %v2684_v28 }
 0x7bf   :  { %1432 = vmatpush.bf16.msra.mxu3 %v2602_v8  ;;  %1419 = vmatpush.bf16.msra.mxu2 %v2621_v23 }
 0x7c1   :  { %1329 = vmatpush.bf16.msra.mxu0 %v2692_v43  ;;  %1342 = vmatpush.bf16.msra.mxu1 %v2695_v48 }
 0x7c3   :  { %1433 = vmatpush.bf16.msra.mxu3 %v2617_v19  ;;  %1420 = vmatpush.bf16.msra.mxu2 %v2629_v27 }
 0x7c5   :  { %1330 = vmatpush.bf16.msra.mxu0 %v2703_v58  ;;  %1343 = vmatpush.bf16.msra.mxu1 %v2706_v60 }
 0x7c7   :  { %1434 = vmatpush.bf16.msra.mxu3 %v2626_v26  ;;  %1421 = vmatpush.bf16.msra.mxu2 %v2636_v30 }
 0x7c9   :  { %1331 = vmatpush.bf16.msra.mxu0 %v2713_v5  ;;  %1344 = vmatpush.bf16.msra.mxu1 %v2718_v7 }
 0x82d   :  { %v1005_v44 = vpop.f32.mrf.mxu2  ;;  %v1018_v10 = vpop.f32.mrf.mxu3 }
 0x82e   :  { %v2944_v12 = vadd.f32 %v1018_v10, %v2941_v1  ;;  %v1022_v6 = vadd.f32 %v1005_v44, %v2956_v39 }
 0x830   :  { %2354 = vtanh.f32 %v2944_v12  ;;  %v2170_v45 = vmul.f32 -1.442695, %v1022_v6  ;;  %v1064_v6 = vrot.slane %v2897_v25, 6  ;;  %v2171_v25 = vmul.f32 -1.442695, %v2944_v12 }
 0x835   :  { %v1007_v54 = vpop.f32.mrf.mxu2  ;;  %v1020_v13 = vpop.f32.mrf.mxu3 }
 0x836   :  { %v2355_v15 = vpop.eup %2354 }
 0x837   :  { %1068 = vrot.lane.b32.xlu0 %v2355_v15, %s2545_s21 }
 0x839   :  { %v1096_v61 = vpop.f32.mrf.mxu0  ;;  %v1109_v17 = vpop.f32.mrf.mxu1 }
 0x83d   :  { %v1122_v20 = vpop.f32.mrf.mxu2  ;;  %v1135_v21 = vpop.f32.mrf.mxu3 }
 0x83e   :  { %v1123_v4 = vadd.f32 %v1122_v20, %v1096_v61  ;;  %v1136_v11 = vadd.f32 %v1135_v21, %v1109_v17 }
 0x840   :  { %v2949_v33 = vadd.f32 %v1136_v11, %v2772_v55  ;;  %v1139_v49 = vadd.f32 %v1123_v4, %v2779_v9 }
 0x841   :  { %v1098_v34 = vpop.f32.mrf.mxu0  ;;  %v1111_v24 = vpop.f32.mrf.mxu1 }
 0x842   :  { %2356 = vtanh.f32 %v2949_v33  ;;  %v2176_v51 = vmul.f32 -1.442695, %v1139_v49 }
 0x843   :  { %2358 = vpow2.f32 %v2170_v45 }
 0x845   :  { %v1124_v35 = vpop.f32.mrf.mxu2  ;;  %v1137_v31 = vpop.f32.mrf.mxu3 }
 0x848   :  { %v2357_v29 = vpop.eup %2356 }
 0x849   :  { %1182 = vrot.lane.b32.xlu1 %v2357_v29, %s2545_s21  ;;  %v2359_v46 = vpop.eup %2358 }
 0x84a   :  { %v1030_v50 = vadd.f32 1.0, %v2359_v46 }
 0x84c   :  { %2360 = vrcp.f32 %v1030_v50  ;;  %v1043_v36 = vand.u32 2147483648, %v1030_v50  ;;  %vm1037_vm14 = vweird.f32 %v1030_v50  ;;  %v1041_v40 = vand.u32 2147483647, %v1030_v50 }
 0x84d   :  { %2362 = vpow2.f32 %v2176_v51 }
 0x84e   :  { %v1044_v10 = vor.u32 1.1754944e-38, %v1043_v36  ;;  %vm1042_vm0 = vcmp.eq.f32.partialorder %v1041_v40, 8.507059e+37 }
 0x852   :  { %v2361_v56 = vpop.eup %2360 }
 0x853   :  { %v1033_v57 = vmul.f32 %v2361_v56, %v1030_v50  ;;  %v2363_v59 = vpop.eup %2362  ;;  %vm1038_vm13 = vweird.f32 %v2361_v56 }
 0x854   :  { %v1147_v38 = vadd.f32 1.0, %v2363_v59  ;;  %vm1039_vm15 = vmor %vm1037_vm14, %vm1038_vm13 }
 0x855   :  { %v1034_v63 = vsub.f32 1.0, %v1033_v57 }
 0x856   :  { %2364 = vrcp.f32 %v1147_v38  ;;  %v1160_v4 = vand.u32 2147483648, %v1147_v38  ;;  %vm1154_vm2 = vweird.f32 %v1147_v38  ;;  %v1158_v11 = vand.u32 2147483647, %v1147_v38 }
 0x857   :  { %v1035_v32 = vmul.f32 %v2361_v56, %v1034_v63 }
 0x858   :  { %v1161_v24 = vor.u32 1.1754944e-38, %v1160_v4  ;;  %vm1159_vm4 = vcmp.eq.f32.partialorder %v1158_v11, 8.507059e+37 }
 0x859   :  { %v1036_v42 = vadd.f32 %v2361_v56, %v1035_v32  ;;  %v2177_v32 = vmul.f32 -1.442695, %v2949_v33 }
 0x85b   :  { %v1040_v44 = vsel %vm1039_vm15, %v2361_v56, %v1036_v42 }
 0x85c   :  { %v2365_v47 = vpop.eup %2364  ;;  %v1045_v15 = vsel %vm1042_vm0, %v1044_v10, %v1040_v44 }
 0x85d   :  { %v1150_v54 = vmul.f32 %v2365_v47, %v1147_v38  ;;  %vm1155_vm1 = vweird.f32 %v2365_v47  ;;  %v1066_v45 = vmul.f32 %v1064_v6, %v1045_v15 }
 0x85e   :  { %vm1156_vm3 = vmor %vm1154_vm2, %vm1155_vm1 }
 0x85f   :  { %v1151_v17 = vsub.f32 1.0, %v1150_v54 }
 0x861   :  { %v1152_v20 = vmul.f32 %v2365_v47, %v1151_v17 }
 0x863   :  { %v1153_v21 = vadd.f32 %v2365_v47, %v1152_v20 }
 0x865   :  { %v1157_v34 = vsel %vm1156_vm3, %v2365_v47, %v1153_v21 }
 0x866   :  { %v1162_v31 = vsel %vm1159_vm4, %v1161_v24, %v1157_v34 }
 0x867   :  { %v1180_v51 = vmul.f32 %v1162_v31, %v2902_v62 }
 0x8a9   :  { %v1069_v13 = vpop.permute.xlu0 %1068 }
 0x8aa   :  { %v1071_v61 = vmul.f32 %v1069_v13, %v1045_v15 }
 0x8ac   :  { %1073 = vrot.lane.b32.xlu2 %v1071_v61, %s2545_s21 }
 0x8bb   :  { %v1183_v35 = vpop.permute.xlu1 %1182 }
 0x8bc   :  { %v1185_v29 = vmul.f32 %v1183_v35, %v1162_v31 }
 0x8be   :  { %1187 = vrot.lane.b32.xlu0 %v1185_v29, %s2545_s21 }
 0x906   :  { %v1074_v46 = vpop.permute.xlu2 %1073 }
 0x907   :  { %v2963_v50 = vadd.f32 %v1074_v46, %v1066_v45 }
 0x909   :  { %2366 = vtanh.f32 %v2963_v50 }
 0x90f   :  { %v2367_v49 = vpop.eup %2366 }
 0x910   :  { %1079 = vrot.lane.b32.xlu1 %v2367_v49, %s2545_s21 }
 0x930   :  { %v1188_v56 = vpop.permute.xlu0 %1187 }
 0x931   :  { %v2968_v57 = vadd.f32 %v1188_v56, %v1180_v51 }
 0x933   :  { %2368 = vtanh.f32 %v2968_v57 }
 0x934   :  { %2370 = vpow2.f32 %v2171_v25 }
 0x939   :  { %v2369_v59 = vpop.eup %2368 }
 0x93a   :  { %1193 = vrot.lane.b32.xlu2 %v2369_v59, %s2545_s21  ;;  %v2371_v63 = vpop.eup %2370 }
 0x93b   :  { %v1031_v38 = vadd.f32 1.0, %v2371_v63 }
 0x93d   :  { %2372 = vrcp.f32 %v1031_v38  ;;  %v1058_v54 = vand.u32 2147483648, %v1031_v38  ;;  %vm1052_vm6 = vweird.f32 %v1031_v38  ;;  %v1056_v13 = vand.u32 2147483647, %v1031_v38 }
 0x93e   :  { %2374 = vpow2.f32 %v2177_v32 }
 0x93f   :  { %v1059_v61 = vor.u32 1.1754944e-38, %v1058_v54  ;;  %vm1057_vm8 = vcmp.eq.f32.partialorder %v1056_v13, 8.507059e+37 }
 0x943   :  { %v2373_v42 = vpop.eup %2372 }
 0x944   :  { %v1048_v36 = vmul.f32 %v2373_v42, %v1031_v38  ;;  %v2375_v62 = vpop.eup %2374  ;;  %vm1053_vm5 = vweird.f32 %v2373_v42 }
 0x945   :  { %v1148_v47 = vadd.f32 1.0, %v2375_v62  ;;  %vm1054_vm7 = vmor %vm1052_vm6, %vm1053_vm5 }
 0x946   :  { %v1049_v40 = vsub.f32 1.0, %v1048_v36 }
 0x947   :  { %2376 = vrcp.f32 %v1148_v47  ;;  %v1175_v35 = vand.u32 2147483648, %v1148_v47  ;;  %vm1169_vm11 = vweird.f32 %v1148_v47  ;;  %v1173_v31 = vand.u32 2147483647, %v1148_v47 }
 0x948   :  { %v1050_v44 = vmul.f32 %v2373_v42, %v1049_v40 }
 0x949   :  { %v1176_v6 = vor.u32 1.1754944e-38, %v1175_v35  ;;  %vm1174_vm13 = vcmp.eq.f32.partialorder %v1173_v31, 8.507059e+37 }
 0x94a   :  { %v1051_v10 = vadd.f32 %v2373_v42, %v1050_v44 }
 0x94c   :  { %v1055_v15 = vsel %vm1054_vm7, %v2373_v42, %v1051_v10 }
 0x94d   :  { %v2377_v12 = vpop.eup %2376  ;;  %v1060_v33 = vsel %vm1057_vm8, %v1059_v61, %v1055_v15 }
 0x94e   :  { %v1165_v17 = vmul.f32 %v2377_v12, %v1148_v47  ;;  %vm1170_vm10 = vweird.f32 %v2377_v12 }
 0x94f   :  { %vm1171_vm12 = vmor %vm1169_vm11, %vm1170_vm10 }
 0x950   :  { %v1166_v11 = vsub.f32 1.0, %v1165_v17 }
 0x952   :  { %v1167_v34 = vmul.f32 %v2377_v12, %v1166_v11 }
 0x954   :  { %v1168_v24 = vadd.f32 %v2377_v12, %v1167_v34 }
 0x956   :  { %v1172_v29 = vsel %vm1171_vm12, %v2377_v12, %v1168_v24 }
 0x957   :  { %v1177_v45 = vsel %vm1174_vm13, %v1176_v6, %v1172_v29 }
 0x982   :  { %v1080_v20 = vpop.permute.xlu1 %1079 }
 0x983   :  { %v1082_v21 = vmul.f32 %v1080_v20, %v1060_v33 }
 0x985   :  { %v1197_v4 = vpack.c.bf16 %v1082_v21, %v1082_v21 }
 0x987   :  { %2178 = vmatmul.msk.bf16.vlgmr.msrb.gmra.mxu0 %vm184_vm9, %v1197_v4  ;;  %2179 = vmatmul.msk.bf16.vlgmr.msrb.gmra.mxu1 %vm184_vm9, %v1197_v4 }
 0x988   :  { %1528 = vmatpush.bf16.msrb.mxu1 %v2665_v2  ;;  %1515 = vmatpush.bf16.msrb.mxu0 %v2663_v0 }
 0x98c   :  { %1529 = vmatpush.bf16.msrb.mxu1 %v2677_v18  ;;  %1516 = vmatpush.bf16.msrb.mxu0 %v2675_v16 }
 0x990   :  { %1530 = vmatpush.bf16.msrb.mxu1 %v2690_v41  ;;  %1517 = vmatpush.bf16.msrb.mxu0 %v2687_v37 }
 0x994   :  { %v1194_v46 = vpop.permute.xlu2 %1193  ;;  %1531 = vmatpush.bf16.msrb.mxu1 %v2700_v53  ;;  %1518 = vmatpush.bf16.msrb.mxu0 %v2698_v52 }
 0x995   :  { %v1196_v49 = vmul.f32 %v1194_v46, %v1177_v45 }
 0x997   :  { %v1294_v51 = vpack.c.bf16 %v1196_v49, %v1196_v49  ;;  %2184 = vmatmul.msk.bf16.vlgmr.msra.gmra.mxu0 %vm184_vm9, %v1197_v4  ;;  %2185 = vmatmul.msk.bf16.vlgmr.msra.gmra.mxu1 %vm184_vm9, %v1197_v4 }
 0x998   :  { %1631 = vmatpush.bf16.msra.mxu0 %v2607_v14  ;;  %1644 = vmatpush.bf16.msra.mxu1 %v2593_v3 }
 0x999   :  { %2182 = vmatmul.msk.bf16.vlgmr.msrb.gmra.mxu2 %vm184_vm9, %v1294_v51  ;;  %2183 = vmatmul.msk.bf16.vlgmr.msrb.gmra.mxu3 %vm184_vm9, %v1294_v51 }
 0x99a   :  { %1554 = vmatpush.bf16.msrb.mxu3 %v2684_v28  ;;  %1541 = vmatpush.bf16.msrb.mxu2 %v2681_v22 }
 0x99c   :  { %1632 = vmatpush.bf16.msra.mxu0 %v2621_v23  ;;  %1645 = vmatpush.bf16.msra.mxu1 %v2602_v8 }
 0x99e   :  { %1555 = vmatpush.bf16.msrb.mxu3 %v2695_v48  ;;  %1542 = vmatpush.bf16.msrb.mxu2 %v2692_v43 }
 0x9a0   :  { %1633 = vmatpush.bf16.msra.mxu0 %v2629_v27  ;;  %1646 = vmatpush.bf16.msra.mxu1 %v2617_v19 }
 0x9a2   :  { %1556 = vmatpush.bf16.msrb.mxu3 %v2706_v60  ;;  %1543 = vmatpush.bf16.msrb.mxu2 %v2703_v58 }
 0x9a4   :  { %1634 = vmatpush.bf16.msra.mxu0 %v2636_v30  ;;  %1647 = vmatpush.bf16.msra.mxu1 %v2626_v26 }
 0x9a6   :  { %1557 = vmatpush.bf16.msrb.mxu3 %v2718_v7  ;;  %1544 = vmatpush.bf16.msrb.mxu2 %v2713_v5 }
 0xa04   :  { %v1210_v3 = vpop.f32.mrf.mxu0  ;;  %v1223_v8 = vpop.f32.mrf.mxu1 }
 0xa05   :  { %v1230_v14 = vrot.slane %v1223_v8, 6  ;;  %v1229_v44 = vrot.slane %v1210_v3, 6 }
 0xa07   :  { %v3005_v23 = vadd.f32 %v1230_v14, %v2941_v1  ;;  %v1233_v10 = vadd.f32 %v1229_v44, %v2956_v39 }
 0xa09   :  { %2378 = vtanh.f32 %v3005_v23  ;;  %v2180_v54 = vmul.f32 -1.442695, %v1233_v10 }
 0xa0c   :  { %v1212_v19 = vpop.f32.mrf.mxu0  ;;  %v1225_v27 = vpop.f32.mrf.mxu1 }
 0xa0f   :  { %v2379_v56 = vpop.eup %2378 }
 0xa10   :  { %1279 = vrot.lane.b32.xlu0 %v2379_v56, %s2545_s21 }
 0xa14   :  { %v1333_v30 = vpop.f32.mrf.mxu0  ;;  %v1346_v59 = vpop.f32.mrf.mxu1 }
 0xa1c   :  { %v1307_v26 = vpop.f32.mrf.mxu2  ;;  %v1320_v25 = vpop.f32.mrf.mxu3 }
 0xa1d   :  { %v1334_v63 = vadd.f32 %v1333_v30, %v1307_v26  ;;  %v1347_v38 = vadd.f32 %v1346_v59, %v1320_v25  ;;  %v1335_v32 = vpop.f32.mrf.mxu0  ;;  %v1348_v42 = vpop.f32.mrf.mxu1 }
 0xa1f   :  { %v3010_v36 = vadd.f32 %v1347_v38, %v2772_v55  ;;  %v1350_v15 = vadd.f32 %v1334_v63, %v2779_v9  ;;  %v1275_v63 = vrot.slane %v2963_v50, 6  ;;  %v2181_v50 = vmul.f32 -1.442695, %v3005_v23 }
 0xa21   :  { %2380 = vtanh.f32 %v3010_v36  ;;  %v2186_v17 = vmul.f32 -1.442695, %v1350_v15  ;;  %v2187_v15 = vmul.f32 -1.442695, %v3010_v36 }
 0xa22   :  { %2382 = vpow2.f32 %v2180_v54 }
 0xa24   :  { %v1309_v62 = vpop.f32.mrf.mxu2  ;;  %v1322_v40 = vpop.f32.mrf.mxu3 }
 0xa27   :  { %v2381_v47 = vpop.eup %2380 }
 0xa28   :  { %1393 = vrot.lane.b32.xlu1 %v2381_v47, %s2545_s21  ;;  %v2383_v13 = vpop.eup %2382 }
 0xa29   :  { %v1241_v12 = vadd.f32 1.0, %v2383_v13 }
 0xa2b   :  { %2384 = vrcp.f32 %v1241_v12  ;;  %v1254_v24 = vand.u32 2147483648, %v1241_v12  ;;  %vm1248_vm15 = vweird.f32 %v1241_v12  ;;  %v1252_v35 = vand.u32 2147483647, %v1241_v12 }
 0xa2c   :  { %2386 = vpow2.f32 %v2186_v17 }
 0xa2d   :  { %v1255_v29 = vor.u32 1.1754944e-38, %v1254_v24  ;;  %vm1253_vm1 = vcmp.eq.f32.partialorder %v1252_v35, 8.507059e+37 }
 0xa31   :  { %v2385_v61 = vpop.eup %2384 }
 0xa32   :  { %v1244_v33 = vmul.f32 %v2385_v61, %v1241_v12  ;;  %v2387_v21 = vpop.eup %2386  ;;  %vm1249_vm14 = vweird.f32 %v2385_v61 }
 0xa33   :  { %v1358_v11 = vadd.f32 1.0, %v2387_v21  ;;  %vm1250_vm0 = vmor %vm1248_vm15, %vm1249_vm14 }
 0xa34   :  { %v1245_v20 = vsub.f32 1.0, %v1244_v33 }
 0xa35   :  { %2388 = vrcp.f32 %v1358_v11  ;;  %v1371_v19 = vand.u32 2147483648, %v1358_v11  ;;  %vm1365_vm3 = vweird.f32 %v1358_v11  ;;  %v1369_v27 = vand.u32 2147483647, %v1358_v11 }
 0xa36   :  { %v1246_v4 = vmul.f32 %v2385_v61, %v1245_v20 }
 0xa37   :  { %v1372_v30 = vor.u32 1.1754944e-38, %v1371_v19  ;;  %vm1370_vm5 = vcmp.eq.f32.partialorder %v1369_v27, 8.507059e+37 }
 0xa38   :  { %v1247_v34 = vadd.f32 %v2385_v61, %v1246_v4 }
 0xa3a   :  { %v1251_v31 = vsel %vm1250_vm0, %v2385_v61, %v1247_v34 }
 0xa3b   :  { %v1256_v6 = vsel %vm1253_vm1, %v1255_v29, %v1251_v31  ;;  %v2389_v49 = vpop.eup %2388 }
 0xa3c   :  { %v1361_v51 = vmul.f32 %v2389_v49, %v1358_v11  ;;  %vm1366_vm2 = vweird.f32 %v2389_v49  ;;  %v1277_v38 = vmul.f32 %v1275_v63, %v1256_v6 }
 0xa3d   :  { %vm1367_vm4 = vmor %vm1365_vm3, %vm1366_vm2 }
 0xa3e   :  { %v1362_v3 = vsub.f32 1.0, %v1361_v51 }
 0xa40   :  { %v1363_v8 = vmul.f32 %v2389_v49, %v1362_v3 }
 0xa42   :  { %v1364_v14 = vadd.f32 %v2389_v49, %v1363_v8 }
 0xa44   :  { %v1368_v56 = vsel %vm1367_vm4, %v2389_v49, %v1364_v14 }
 0xa45   :  { %v1373_v26 = vsel %vm1370_vm5, %v1372_v30, %v1368_v56 }
 0xa46   :  { %v1391_v40 = vmul.f32 %v1373_v26, %v2968_v57 }
 0xa82   :  { %v1280_v45 = vpop.permute.xlu0 %1279 }
 0xa83   :  { %v1282_v46 = vmul.f32 %v1280_v45, %v1256_v6 }
 0xa85   :  { %1284 = vrot.lane.b32.xlu2 %v1282_v46, %s2545_s21 }
 0xa9a   :  { %v1394_v59 = vpop.permute.xlu1 %1393 }
 0xa9b   :  { %v1396_v25 = vmul.f32 %v1394_v59, %v1373_v26 }
 0xa9d   :  { %1398 = vrot.lane.b32.xlu0 %v1396_v25, %s2545_s21 }
 0xadf   :  { %v1285_v32 = vpop.permute.xlu2 %1284 }
 0xae0   :  { %v3019_v42 = vadd.f32 %v1285_v32, %v1277_v38 }
 0xae2   :  { %2390 = vtanh.f32 %v3019_v42 }
 0xae8   :  { %v2391_v62 = vpop.eup %2390 }
 0xae9   :  { %1290 = vrot.lane.b32.xlu1 %v2391_v62, %s2545_s21 }
 0xb0f   :  { %v1399_v47 = vpop.permute.xlu0 %1398 }
 0xb10   :  { %v3024_v44 = vadd.f32 %v1399_v47, %v1391_v40 }
 0xb12   :  { %2392 = vtanh.f32 %v3024_v44 }
 0xb13   :  { %2394 = vpow2.f32 %v2181_v50 }
 0xb18   :  { %v2393_v10 = vpop.eup %2392 }
 0xb19   :  { %1404 = vrot.lane.b32.xlu2 %v2393_v10, %s2545_s21  ;;  %v2395_v54 = vpop.eup %2394 }
 0xb1a   :  { %v1242_v13 = vadd.f32 1.0, %v2395_v54 }
 0xb1c   :  { %2396 = vrcp.f32 %v1242_v13  ;;  %v1269_v4 = vand.u32 2147483648, %v1242_v13  ;;  %vm1263_vm7 = vweird.f32 %v1242_v13  ;;  %v1267_v11 = vand.u32 2147483647, %v1242_v13 }
 0xb1d   :  { %2398 = vpow2.f32 %v2187_v15 }
 0xb1e   :  { %v1270_v34 = vor.u32 1.1754944e-38, %v1269_v4  ;;  %vm1268_vm10 = vcmp.eq.f32.partialorder %v1267_v11, 8.507059e+37 }
 0xb22   :  { %v2397_v12 = vpop.eup %2396 }
 0xb23   :  { %v1259_v61 = vmul.f32 %v2397_v12, %v1242_v13  ;;  %v2399_v17 = vpop.eup %2398  ;;  %vm1264_vm6 = vweird.f32 %v2397_v12 }
 0xb24   :  { %v1359_v20 = vadd.f32 1.0, %v2399_v17  ;;  %vm1265_vm8 = vmor %vm1263_vm7, %vm1264_vm6 }
 0xb25   :  { %v1260_v57 = vsub.f32 1.0, %v1259_v61 }
 0xb26   :  { %2400 = vrcp.f32 %v1359_v20  ;;  %v1386_v3 = vand.u32 2147483648, %v1359_v20  ;;  %vm1380_vm12 = vweird.f32 %v1359_v20  ;;  %v1384_v8 = vand.u32 2147483647, %v1359_v20 }
 0xb27   :  { %v1261_v33 = vmul.f32 %v2397_v12, %v1260_v57 }
 0xb28   :  { %v1387_v19 = vor.u32 1.1754944e-38, %v1386_v3  ;;  %vm1385_vm14 = vcmp.eq.f32.partialorder %v1384_v8, 8.507059e+37 }
 0xb29   :  { %v1262_v21 = vadd.f32 %v2397_v12, %v1261_v33 }
 0xb2b   :  { %v1266_v23 = vsel %vm1265_vm8, %v2397_v12, %v1262_v21 }
 0xb2c   :  { %v1271_v24 = vsel %vm1268_vm10, %v1270_v34, %v1266_v23  ;;  %v2401_v36 = vpop.eup %2400 }
 0xb2d   :  { %v1376_v45 = vmul.f32 %v2401_v36, %v1359_v20  ;;  %vm1381_vm11 = vweird.f32 %v2401_v36 }
 0xb2e   :  { %vm1382_vm13 = vmor %vm1380_vm12, %vm1381_vm11 }
 0xb2f   :  { %v1377_v46 = vsub.f32 1.0, %v1376_v45 }
 0xb31   :  { %v1378_v49 = vmul.f32 %v2401_v36, %v1377_v46 }
 0xb33   :  { %v1379_v51 = vadd.f32 %v2401_v36, %v1378_v49 }
 0xb35   :  { %v1383_v14 = vsel %vm1382_vm13, %v2401_v36, %v1379_v51 }
 0xb36   :  { %v1388_v27 = vsel %vm1385_vm14, %v1387_v19, %v1383_v14 }
 0xb5b   :  { %v1291_v35 = vpop.permute.xlu1 %1290 }
 0xb5c   :  { %v1293_v31 = vmul.f32 %v1291_v35, %v1271_v24 }
 0xb5e   :  { %v1408_v29 = vpack.c.bf16 %v1293_v31, %v1293_v31 }
 0xb60   :  { %v1410_v6 = vrot.slane %v1408_v29, 1 }
 0xb62   :  { %2188 = vmatmul.msk.bf16.vlgmr.msra.gmra.mxu2 %vm184_vm9, %v1410_v6  ;;  %2189 = vmatmul.msk.bf16.vlgmr.msra.gmra.mxu3 %vm184_vm9, %v1410_v6 }
 0xb63   :  { %1741 = vmatpush.bf16.msra.mxu3 %v2665_v2  ;;  %1728 = vmatpush.bf16.msra.mxu2 %v2663_v0 }
 0xb67   :  { %1742 = vmatpush.bf16.msra.mxu3 %v2677_v18  ;;  %1729 = vmatpush.bf16.msra.mxu2 %v2675_v16 }
 0xb6b   :  { %1743 = vmatpush.bf16.msra.mxu3 %v2690_v41  ;;  %1730 = vmatpush.bf16.msra.mxu2 %v2687_v37 }
 0xb6f   :  { %1744 = vmatpush.bf16.msra.mxu3 %v2700_v53  ;;  %1731 = vmatpush.bf16.msra.mxu2 %v2698_v52 }
 0xb72   :  { %2194 = vmatmul.msk.bf16.vlgmr.msrb.gmra.mxu2 %vm184_vm9, %v1410_v6  ;;  %2195 = vmatmul.msk.bf16.vlgmr.msrb.gmra.mxu3 %vm184_vm9, %v1410_v6 }
 0xb73   :  { %v1405_v56 = vpop.permute.xlu2 %1404  ;;  %1855 = vmatpush.bf16.msrb.mxu3 %v2665_v2  ;;  %1842 = vmatpush.bf16.msrb.mxu2 %v2663_v0 }
 0xb74   :  { %v1407_v30 = vmul.f32 %v1405_v56, %v1388_v27 }
 0xb76   :  { %v1507_v59 = vpack.c.bf16 %v1407_v30, %v1407_v30 }
 0xb77   :  { %1856 = vmatpush.bf16.msrb.mxu3 %v2677_v18  ;;  %1843 = vmatpush.bf16.msrb.mxu2 %v2675_v16 }
 0xb78   :  { %2192 = vmatmul.msk.bf16.vlgmr.msrb.gmra.mxu0 %vm184_vm9, %v1507_v59  ;;  %2193 = vmatmul.msk.bf16.vlgmr.msrb.gmra.mxu1 %vm184_vm9, %v1507_v59 }
 0xb79   :  { %1754 = vmatpush.bf16.msrb.mxu0 %v2681_v22  ;;  %1767 = vmatpush.bf16.msrb.mxu1 %v2684_v28 }
 0xb7b   :  { %1857 = vmatpush.bf16.msrb.mxu3 %v2690_v41  ;;  %1844 = vmatpush.bf16.msrb.mxu2 %v2687_v37 }
 0xb7d   :  { %1755 = vmatpush.bf16.msrb.mxu0 %v2692_v43  ;;  %1768 = vmatpush.bf16.msrb.mxu1 %v2695_v48 }
 0xb7f   :  { %1858 = vmatpush.bf16.msrb.mxu3 %v2700_v53  ;;  %1845 = vmatpush.bf16.msrb.mxu2 %v2698_v52 }
 0xb81   :  { %1756 = vmatpush.bf16.msrb.mxu0 %v2703_v58  ;;  %1769 = vmatpush.bf16.msrb.mxu1 %v2706_v60 }
 0xb85   :  { %1757 = vmatpush.bf16.msrb.mxu0 %v2713_v5  ;;  %1770 = vmatpush.bf16.msrb.mxu1 %v2718_v7 }
 0xbe5   :  { %v1423_v0 = vpop.f32.mrf.mxu2  ;;  %v1436_v2 = vpop.f32.mrf.mxu3 }
 0xbe6   :  { %v1443_v16 = vrot.slane %v1436_v2, 4  ;;  %v1442_v13 = vrot.slane %v1423_v0, 4 }
 0xbe8   :  { %v3061_v18 = vadd.f32 %v1443_v16, %v2941_v1  ;;  %v1446_v12 = vadd.f32 %v1442_v13, %v2956_v39  ;;  %v1488_v16 = vrot.slane %v3019_v42, 6 }
 0xbea   :  { %2402 = vtanh.f32 %v3061_v18  ;;  %v2190_v15 = vmul.f32 -1.442695, %v1446_v12  ;;  %v2191_v42 = vmul.f32 -1.442695, %v3061_v18 }
 0xbed   :  { %v1425_v37 = vpop.f32.mrf.mxu2  ;;  %v1438_v41 = vpop.f32.mrf.mxu3 }
 0xbf0   :  { %v2403_v53 = vpop.eup %2402 }
 0xbf1   :  { %1492 = vrot.lane.b32.xlu0 %v2403_v53, %s2545_s21 }
 0xbf5   :  { %v1520_v52 = vpop.f32.mrf.mxu0  ;;  %v1533_v26 = vpop.f32.mrf.mxu1 }
 0xbf6   :  { %v1546_v25 = vpop.f32.mrf.mxu2  ;;  %v1559_v63 = vpop.f32.mrf.mxu3 }
 0xbf7   :  { %v1547_v38 = vadd.f32 %v1546_v25, %v1520_v52  ;;  %v1560_v32 = vadd.f32 %v1559_v63, %v1533_v26 }
 0xbf9   :  { %v3066_v62 = vadd.f32 %v1560_v32, %v2772_v55  ;;  %v1563_v17 = vadd.f32 %v1547_v38, %v2779_v9 }
 0xbfb   :  { %2404 = vtanh.f32 %v3066_v62  ;;  %v2196_v33 = vmul.f32 -1.442695, %v1563_v17 }
 0xbfc   :  { %2406 = vpow2.f32 %v2190_v15 }
 0xbfd   :  { %v1522_v40 = vpop.f32.mrf.mxu0  ;;  %v1535_v47 = vpop.f32.mrf.mxu1 }
 0xbfe   :  { %v1548_v10 = vpop.f32.mrf.mxu2  ;;  %v1561_v50 = vpop.f32.mrf.mxu3  ;;  %v2197_v47 = vmul.f32 -1.442695, %v3066_v62 }
 0xc01   :  { %v2405_v54 = vpop.eup %2404 }
 0xc02   :  { %1606 = vrot.lane.b32.xlu1 %v2405_v54, %s2545_s21  ;;  %v2407_v61 = vpop.eup %2406 }
 0xc03   :  { %v1454_v57 = vadd.f32 1.0, %v2407_v61 }
 0xc05   :  { %2408 = vrcp.f32 %v1454_v57  ;;  %v1467_v35 = vand.u32 2147483648, %v1454_v57  ;;  %vm1461_vm0 = vweird.f32 %v1454_v57  ;;  %v1465_v36 = vand.u32 2147483647, %v1454_v57 }
 0xc06   :  { %2410 = vpow2.f32 %v2196_v33 }
 0xc07   :  { %v1468_v6 = vor.u32 1.1754944e-38, %v1467_v35  ;;  %vm1466_vm2 = vcmp.eq.f32.partialorder %v1465_v36, 8.507059e+37 }
 0xc0b   :  { %v2409_v20 = vpop.eup %2408 }
 0xc0c   :  { %v1457_v21 = vmul.f32 %v2409_v20, %v1454_v57  ;;  %v2411_v4 = vpop.eup %2410  ;;  %vm1462_vm15 = vweird.f32 %v2409_v20 }
 0xc0d   :  { %v1571_v11 = vadd.f32 1.0, %v2411_v4  ;;  %vm1463_vm1 = vmor %vm1461_vm0, %vm1462_vm15 }
 0xc0e   :  { %v1458_v23 = vsub.f32 1.0, %v1457_v21 }
 0xc0f   :  { %2412 = vrcp.f32 %v1571_v11  ;;  %v1584_v19 = vand.u32 2147483648, %v1571_v11  ;;  %vm1578_vm4 = vweird.f32 %v1571_v11  ;;  %v1582_v27 = vand.u32 2147483647, %v1571_v11 }
 0xc10   :  { %v1459_v34 = vmul.f32 %v2409_v20, %v1458_v23 }
 0xc11   :  { %v1585_v30 = vor.u32 1.1754944e-38, %v1584_v19  ;;  %vm1583_vm6 = vcmp.eq.f32.partialorder %v1582_v27, 8.507059e+37 }
 0xc12   :  { %v1460_v24 = vadd.f32 %v2409_v20, %v1459_v34 }
 0xc14   :  { %v1464_v29 = vsel %vm1463_vm1, %v2409_v20, %v1460_v24 }
 0xc15   :  { %v2413_v31 = vpop.eup %2412  ;;  %v1469_v49 = vsel %vm1466_vm2, %v1468_v6, %v1464_v29 }
 0xc16   :  { %v1574_v45 = vmul.f32 %v2413_v31, %v1571_v11  ;;  %vm1579_vm3 = vweird.f32 %v2413_v31  ;;  %v1490_v37 = vmul.f32 %v1488_v16, %v1469_v49 }
 0xc17   :  { %vm1580_vm5 = vmor %vm1578_vm4, %vm1579_vm3 }
 0xc18   :  { %v1575_v3 = vsub.f32 1.0, %v1574_v45 }
 0xc1a   :  { %v1576_v8 = vmul.f32 %v2413_v31, %v1575_v3 }
 0xc1c   :  { %v1577_v14 = vadd.f32 %v2413_v31, %v1576_v8 }
 0xc1e   :  { %v1581_v56 = vsel %vm1580_vm5, %v2413_v31, %v1577_v14 }
 0xc1f   :  { %v1586_v0 = vsel %vm1583_vm6, %v1585_v30, %v1581_v56 }
 0xc20   :  { %v1604_v26 = vmul.f32 %v1586_v0, %v3024_v44 }
 0xc63   :  { %v1493_v46 = vpop.permute.xlu0 %1492 }
 0xc64   :  { %v1495_v51 = vmul.f32 %v1493_v46, %v1469_v49 }
 0xc66   :  { %1497 = vrot.lane.b32.xlu2 %v1495_v51, %s2545_s21 }
 0xc74   :  { %v1607_v59 = vpop.permute.xlu1 %1606 }
 0xc75   :  { %v1609_v2 = vmul.f32 %v1607_v59, %v1586_v0 }
 0xc77   :  { %1611 = vrot.lane.b32.xlu0 %v1609_v2, %s2545_s21 }
 0xcc0   :  { %v1498_v41 = vpop.permute.xlu2 %1497 }
 0xcc1   :  { %v3075_v53 = vadd.f32 %v1498_v41, %v1490_v37 }
 0xcc3   :  { %2414 = vtanh.f32 %v3075_v53 }
 0xcc9   :  { %v2415_v52 = vpop.eup %2414 }
 0xcca   :  { %1503 = vrot.lane.b32.xlu1 %v2415_v52, %s2545_s21 }
 0xce9   :  { %v1612_v25 = vpop.permute.xlu0 %1611 }
 0xcea   :  { %v3080_v63 = vadd.f32 %v1612_v25, %v1604_v26 }
 0xcec   :  { %2416 = vtanh.f32 %v3080_v63 }
 0xced   :  { %2418 = vpow2.f32 %v2191_v42 }
 0xcf2   :  { %v2417_v38 = vpop.eup %2416 }
 0xcf3   :  { %1617 = vrot.lane.b32.xlu2 %v2417_v38, %s2545_s21  ;;  %v2419_v32 = vpop.eup %2418 }
 0xcf4   :  { %v1455_v40 = vadd.f32 1.0, %v2419_v32 }
 0xcf6   :  { %2420 = vrcp.f32 %v1455_v40  ;;  %v1482_v61 = vand.u32 2147483648, %v1455_v40  ;;  %vm1476_vm8 = vweird.f32 %v1455_v40  ;;  %v1480_v18 = vand.u32 2147483647, %v1455_v40 }
 0xcf7   :  { %2422 = vpow2.f32 %v2197_v47 }
 0xcf8   :  { %v1483_v33 = vor.u32 1.1754944e-38, %v1482_v61  ;;  %vm1481_vm11 = vcmp.eq.f32.partialorder %v1480_v18, 8.507059e+37 }
 0xcfc   :  { %v2421_v10 = vpop.eup %2420 }
 0xcfd   :  { %v1472_v50 = vmul.f32 %v2421_v10, %v1455_v40  ;;  %v2423_v44 = vpop.eup %2422  ;;  %vm1477_vm7 = vweird.f32 %v2421_v10 }
 0xcfe   :  { %v1572_v54 = vadd.f32 1.0, %v2423_v44  ;;  %vm1478_vm10 = vmor %vm1476_vm8, %vm1477_vm7 }
 0xcff   :  { %v1473_v13 = vsub.f32 1.0, %v1472_v50 }
 0xd00   :  { %2424 = vrcp.f32 %v1572_v54  ;;  %v1599_v31 = vand.u32 2147483648, %v1572_v54  ;;  %vm1593_vm13 = vweird.f32 %v1572_v54  ;;  %v1597_v36 = vand.u32 2147483647, %v1572_v54 }
 0xd01   :  { %v1474_v12 = vmul.f32 %v2421_v10, %v1473_v13 }
 0xd02   :  { %v1600_v6 = vor.u32 1.1754944e-38, %v1599_v31  ;;  %vm1598_vm15 = vcmp.eq.f32.partialorder %v1597_v36, 8.507059e+37  ;;  %v1701_v36 = vrot.slane %v3075_v53, 6 }
 0xd03   :  { %v1475_v15 = vadd.f32 %v2421_v10, %v1474_v12 }
 0xd05   :  { %v1479_v17 = vsel %vm1478_vm10, %v2421_v10, %v1475_v15 }
 0xd06   :  { %v2425_v57 = vpop.eup %2424  ;;  %v1484_v62 = vsel %vm1481_vm11, %v1483_v33, %v1479_v17 }
 0xd07   :  { %v1589_v20 = vmul.f32 %v2425_v57, %v1572_v54  ;;  %vm1594_vm12 = vweird.f32 %v2425_v57 }
 0xd08   :  { %vm1595_vm14 = vmor %vm1593_vm13, %vm1594_vm12 }
 0xd09   :  { %v1590_v11 = vsub.f32 1.0, %v1589_v20 }
 0xd0b   :  { %v1591_v24 = vmul.f32 %v2425_v57, %v1590_v11 }
 0xd0d   :  { %v1592_v35 = vadd.f32 %v2425_v57, %v1591_v24 }
 0xd0f   :  { %v1596_v29 = vsel %vm1595_vm14, %v2425_v57, %v1592_v35 }
 0xd3c   :  { %v1504_v21 = vpop.permute.xlu1 %1503 }
 0xd3d   :  { %v1506_v4 = vmul.f32 %v1504_v21, %v1484_v62 }
 0xd3f   :  { %v1621_v23 = vpack.c.bf16 %v1506_v4, %v1506_v4 }
 0xd41   :  { %v1623_v34 = vrot.slane %v1621_v23, 2 }
 0xd43   :  { %2198 = vmatmul.msk.bf16.vlgmr.msra.gmra.mxu0 %vm184_vm9, %v1623_v34  ;;  %2199 = vmatmul.msk.bf16.vlgmr.msra.gmra.mxu1 %vm184_vm9, %v1623_v34 }
 0xd44   :  { %1874 = vmatpush.bf16.msra.mxu0 %v2681_v22  ;;  %1887 = vmatpush.bf16.msra.mxu1 %v2684_v28  ;;  %v1601_v22 = vsel %vm1598_vm15, %v1600_v6, %v1596_v29 }
 0xd48   :  { %1875 = vmatpush.bf16.msra.mxu0 %v2692_v43  ;;  %1888 = vmatpush.bf16.msra.mxu1 %v2695_v48 }
 0xd4c   :  { %1876 = vmatpush.bf16.msra.mxu0 %v2703_v58  ;;  %1889 = vmatpush.bf16.msra.mxu1 %v2706_v60 }
 0xd4d   :  { %v1618_v45 = vpop.permute.xlu2 %1617 }
 0xd4e   :  { %v1620_v28 = vmul.f32 %v1618_v45, %v1601_v22 }
 0xd50   :  { %v1720_v46 = vpack.c.bf16 %v1620_v28, %v1620_v28  ;;  %1877 = vmatpush.bf16.msra.mxu0 %v2713_v5  ;;  %1890 = vmatpush.bf16.msra.mxu1 %v2718_v7 }
 0xd52   :  { %2202 = vmatmul.msk.bf16.vlgmr.msra.gmra.mxu2 %vm184_vm9, %v1720_v46  ;;  %2203 = vmatmul.msk.bf16.vlgmr.msra.gmra.mxu3 %vm184_vm9, %v1720_v46 }
 0xd53   :  { %2204 = vmatmul.msk.bf16.vlgmr.msrb.gmra.mxu0 %vm184_vm9, %v1623_v34  ;;  %2205 = vmatmul.msk.bf16.vlgmr.msrb.gmra.mxu1 %vm184_vm9, %v1623_v34 }
 0xdc0   :  { %v1636_v43 = vpop.f32.mrf.mxu0  ;;  %v1649_v48 = vpop.f32.mrf.mxu1 }
 0xdc1   :  { %v1656_v58 = vrot.slane %v1649_v48, 2  ;;  %v1655_v16 = vrot.slane %v1636_v43, 2 }
 0xdc3   :  { %v3101_v60 = vadd.f32 %v1656_v58, %v2941_v1  ;;  %v1659_v37 = vadd.f32 %v1655_v16, %v2956_v39 }
 0xdc5   :  { %2426 = vtanh.f32 %v3101_v60  ;;  %v2200_v41 = vmul.f32 -1.442695, %v1659_v37  ;;  %v2201_v48 = vmul.f32 -1.442695, %v3101_v60 }
 0xdc8   :  { %v1638_v49 = vpop.f32.mrf.mxu0  ;;  %v1651_v5 = vpop.f32.mrf.mxu1 }
 0xdcb   :  { %v2427_v51 = vpop.eup %2426 }
 0xdcc   :  { %1705 = vrot.lane.b32.xlu1 %v2427_v51, %s2545_s21 }
 0xdd0   :  { %v1759_v7 = vpop.f32.mrf.mxu0  ;;  %v1772_v3 = vpop.f32.mrf.mxu1 }
 0xdd5   :  { %v1733_v8 = vpop.f32.mrf.mxu2  ;;  %v1746_v14 = vpop.f32.mrf.mxu3 }
 0xdd6   :  { %v1760_v19 = vadd.f32 %v1759_v7, %v1733_v8  ;;  %v1773_v27 = vadd.f32 %v1772_v3, %v1746_v14 }
 0xdd8   :  { %v3106_v56 = vadd.f32 %v1773_v27, %v2772_v55  ;;  %v1761_v30 = vpop.f32.mrf.mxu0  ;;  %v1774_v59 = vpop.f32.mrf.mxu1  ;;  %v1776_v25 = vadd.f32 %v1760_v19, %v2779_v9 }
 0xdda   :  { %2428 = vtanh.f32 %v3106_v56  ;;  %v2206_v38 = vmul.f32 -1.442695, %v1776_v25  ;;  %v2207_v58 = vmul.f32 -1.442695, %v3106_v56 }
 0xddb   :  { %2430 = vpow2.f32 %v2200_v41 }
 0xddd   :  { %v1735_v1 = vpop.f32.mrf.mxu2  ;;  %v1748_v0 = vpop.f32.mrf.mxu3 }
 0xde0   :  { %v2429_v2 = vpop.eup %2428 }
 0xde1   :  { %1819 = vrot.lane.b32.xlu0 %v2429_v2, %s2545_s21  ;;  %v2431_v52 = vpop.eup %2430 }
 0xde2   :  { %v1667_v26 = vadd.f32 1.0, %v2431_v52 }
 0xde4   :  { %2432 = vrcp.f32 %v1667_v26  ;;  %v1680_v54 = vand.u32 2147483648, %v1667_v26  ;;  %vm1674_vm1 = vweird.f32 %v1667_v26  ;;  %v1678_v39 = vand.u32 2147483647, %v1667_v26 }
 0xde5   :  { %2434 = vpow2.f32 %v2206_v38 }
 0xde6   :  { %v1681_v12 = vor.u32 1.1754944e-38, %v1680_v54  ;;  %vm1679_vm3 = vcmp.eq.f32.partialorder %v1678_v39, 8.507059e+37 }
 0xdea   :  { %v2433_v42 = vpop.eup %2432 }
 0xdeb   :  { %v1670_v32 = vmul.f32 %v2433_v42, %v1667_v26  ;;  %v2435_v47 = vpop.eup %2434  ;;  %vm1675_vm0 = vweird.f32 %v2433_v42 }
 0xdec   :  { %v1784_v10 = vadd.f32 1.0, %v2435_v47  ;;  %vm1676_vm2 = vmor %vm1674_vm1, %vm1675_vm0 }
 0xded   :  { %v1671_v40 = vsub.f32 1.0, %v1670_v32 }
 0xdee   :  { %2436 = vrcp.f32 %v1784_v10  ;;  %v1797_v21 = vand.u32 2147483648, %v1784_v10  ;;  %vm1791_vm5 = vweird.f32 %v1784_v10  ;;  %v1795_v4 = vand.u32 2147483647, %v1784_v10 }
 0xdef   :  { %v1672_v50 = vmul.f32 %v2433_v42, %v1671_v40 }
 0xdf0   :  { %v1798_v23 = vor.u32 1.1754944e-38, %v1797_v21  ;;  %vm1796_vm7 = vcmp.eq.f32.partialorder %v1795_v4, 8.507059e+37 }
 0xdf1   :  { %v1673_v44 = vadd.f32 %v2433_v42, %v1672_v50 }
 0xdf3   :  { %v1677_v13 = vsel %vm1676_vm2, %v2433_v42, %v1673_v44 }
 0xdf4   :  { %v2437_v15 = vpop.eup %2436  ;;  %v1682_v57 = vsel %vm1679_vm3, %v1681_v12, %v1677_v13 }
 0xdf5   :  { %v1787_v17 = vmul.f32 %v2437_v15, %v1784_v10  ;;  %vm1792_vm4 = vweird.f32 %v2437_v15  ;;  %v1703_v22 = vmul.f32 %v1701_v36, %v1682_v57 }
 0xdf6   :  { %vm1793_vm6 = vmor %vm1791_vm5, %vm1792_vm4 }
 0xdf7   :  { %v1788_v33 = vsub.f32 1.0, %v1787_v17 }
 0xdf9   :  { %v1789_v20 = vmul.f32 %v2437_v15, %v1788_v33 }
 0xdfb   :  { %v1790_v62 = vadd.f32 %v2437_v15, %v1789_v20 }
 0xdfd   :  { %v1794_v11 = vsel %vm1793_vm6, %v2437_v15, %v1790_v62 }
 0xdfe   :  { %v1799_v24 = vsel %vm1796_vm7, %v1798_v23, %v1794_v11 }
 0xdff   :  { %v1817_v31 = vmul.f32 %v1799_v24, %v3080_v63 }
 0xe3e   :  { %v1706_v61 = vpop.permute.xlu1 %1705 }
 0xe3f   :  { %v1708_v18 = vmul.f32 %v1706_v61, %v1682_v57 }
 0xe41   :  { %1710 = vrot.lane.b32.xlu0 %v1708_v18, %s2545_s21 }
 0xe53   :  { %v1820_v34 = vpop.permute.xlu0 %1819 }
 0xe54   :  { %v1822_v35 = vmul.f32 %v1820_v34, %v1799_v24 }
 0xe56   :  { %1824 = vrot.lane.b32.xlu2 %v1822_v35, %s2545_s21 }
 0xeb0   :  { %v1825_v29 = vpop.permute.xlu2 %1824 }
 0xeb1   :  { %v3116_v6 = vadd.f32 %v1825_v29, %v1817_v31 }
 0xeb3   :  { %2438 = vtanh.f32 %v3116_v6  ;;  %v1711_v45 = vpop.permute.xlu0 %1710 }
 0xeb4   :  { %v1713_v28 = vadd.f32 %v1711_v45, %v1703_v22 }
 0xeb6   :  { %2440 = vtanh.f32 %v1713_v28 }
 0xeb7   :  { %2442 = vpow2.f32 %v2201_v48  ;;  %v2259_v48 = vld [vmem:[%s3157_s5 + $0x8] sm:$0xff] }
 0xeb9   :  { %v2439_v46 = vpop.eup %2438 }
 0xeba   :  { %1830 = vrot.lane.b32.xlu1 %v2439_v46, %s2545_s21  ;;  %v2261_v46 = vld [vmem:[%s3157_s5 + $0x18] sm:$0xff] }
 0xebb   :  { %1998 = vmatpush.bf16.msra.mxu2 %v2261_v46 }
 0xebc   :  { %v2441_v43 = vpop.eup %2440 }
 0xebd   :  { %1716 = vrot.lane.b32.xlu2 %v2441_v43, %s2545_s21  ;;  %v2443_v63 = vpop.eup %2442  ;;  %v2260_v43 = vld [vmem:[%s3157_s5 + $0x10] sm:$0xff] }
 0xebe   :  { %v1668_v53 = vadd.f32 1.0, %v2443_v63 }
 0xebf   :  { %1999 = vmatpush.bf16.msra.mxu2 %v2260_v43 }
 0xec0   :  { %2444 = vrcp.f32 %v1668_v53  ;;  %v1695_v19 = vand.u32 2147483648, %v1668_v53  ;;  %vm1689_vm10 = vweird.f32 %v1668_v53  ;;  %v1693_v27 = vand.u32 2147483647, %v1668_v53 }
 0xec1   :  { %2446 = vpow2.f32 %v2207_v58 }
 0xec2   :  { %v1696_v30 = vor.u32 1.1754944e-38, %v1695_v19  ;;  %vm1694_vm12 = vcmp.eq.f32.partialorder %v1693_v27, 8.507059e+37 }
 0xec3   :  { %2000 = vmatpush.bf16.msra.mxu2 %v2259_v48 }
 0xec6   :  { %v2445_v49 = vpop.eup %2444 }
 0xec7   :  { %v1685_v5 = vmul.f32 %v2445_v49, %v1668_v53  ;;  %v2447_v7 = vpop.eup %2446  ;;  %vm1690_vm8 = vweird.f32 %v2445_v49 }
 0xec8   :  { %v1785_v3 = vadd.f32 1.0, %v2447_v7  ;;  %vm1691_vm11 = vmor %vm1689_vm10, %vm1690_vm8  ;;  %vm2007_vm10 = vcmask 33792  }
 0xec9   :  { %v1686_v51 = vsub.f32 1.0, %v1685_v5 }
 0xeca   :  { %2448 = vrcp.f32 %v1785_v3  ;;  %v1812_v25 = vand.u32 2147483648, %v1785_v3  ;;  %vm1806_vm14 = vweird.f32 %v1785_v3  ;;  %v1810_v38 = vand.u32 2147483647, %v1785_v3 }
 0xecb   :  { %v1687_v8 = vmul.f32 %v2445_v49, %v1686_v51 }
 0xecc   :  { %v1813_v32 = vor.u32 1.1754944e-38, %v1812_v25  ;;  %vm1811_vm0 = vcmp.eq.f32.partialorder %v1810_v38, 8.507059e+37 }
 0xecd   :  { %v1688_v14 = vadd.f32 %v2445_v49, %v1687_v8 }
 0xecf   :  { %v1692_v60 = vsel %vm1691_vm11, %v2445_v49, %v1688_v14 }
 0xed0   :  { %v2449_v59 = vpop.eup %2448  ;;  %v1697_v1 = vsel %vm1694_vm12, %v1696_v30, %v1692_v60 }
 0xed1   :  { %v1802_v2 = vmul.f32 %v2449_v59, %v1785_v3  ;;  %vm1807_vm13 = vweird.f32 %v2449_v59  ;;  %v2258_v3 = vld [vmem:[%s3157_s5] sm:$0xff] }
 0xed2   :  { %vm1808_vm15 = vmor %vm1806_vm14, %vm1807_vm13  ;;  %2001 = vmatpush.bf16.msra.mxu2 %v2258_v3 }
 0xed3   :  { %v1803_v41 = vsub.f32 1.0, %v1802_v2 }
 0xed5   :  { %v1804_v52 = vmul.f32 %v2449_v59, %v1803_v41 }
 0xed7   :  { %v1805_v26 = vadd.f32 %v2449_v59, %v1804_v52 }
 0xed9   :  { %v1809_v42 = vsel %vm1808_vm15, %v2449_v59, %v1805_v26 }
 0xeda   :  { %v1814_v40 = vsel %vm1811_vm0, %v1813_v32, %v1809_v42 }
 0xf17   :  { %v1717_v56 = vpop.permute.xlu2 %1716 }
 0xf18   :  { %v1719_v0 = vmul.f32 %v1717_v56, %v1697_v1 }
 0xf1a   :  { %v1864_v16 = vpack.c.bf16 %v1719_v0, %v1719_v0 }
 0xf1c   :  { %v1866_v37 = vrot.slane %v1864_v16, 3 }
 0xf1e   :  { %2210 = vmatmul.msk.bf16.vlgmr.msra.gmra.mxu0 %vm184_vm9, %v1866_v37  ;;  %2211 = vmatmul.msk.bf16.vlgmr.msra.gmra.mxu1 %vm184_vm9, %v1866_v37  ;;  %v2269_v37 = vld [vmem:[%s3158_s6] ss:$0 sm:$0xff] }
 0xf2c   :  { %v1831_v47 = vpop.permute.xlu1 %1830 }
 0xf2d   :  { %v1833_v10 = vmul.f32 %v1831_v47, %v1814_v40 }
 0xf2f   :  { %v1834_v50 = vpack.c.bf16 %v1833_v10, %v1833_v10 }
 0xf31   :  { %2208 = vmatmul.msk.bf16.vlgmr.msrb.gmra.mxu2 %vm184_vm9, %v1834_v50  ;;  %2209 = vmatmul.msk.bf16.vlgmr.msrb.gmra.mxu3 %vm184_vm9, %v1834_v50 }
 0xf9b   :  { %v1879_v44 = vpop.f32.mrf.mxu0  ;;  %v1892_v54 = vpop.f32.mrf.mxu1 }
 0xfa3   :  { %v1881_v39 = vpop.f32.mrf.mxu0  ;;  %v1894_v13 = vpop.f32.mrf.mxu1 }
 0xfb4   :  { %v1847_v12 = vpop.f32.mrf.mxu2  ;;  %v1860_v15 = vpop.f32.mrf.mxu3 }
 0xfb5   :  { %v1880_v61 = vadd.f32 %v1879_v44, %v1847_v12  ;;  %v1893_v57 = vadd.f32 %v1892_v54, %v1860_v15 }
 0xfb7   :  { %v1897_v18 = vadd.f32 %v1893_v57, %v2772_v55  ;;  %v1896_v62 = vadd.f32 %v1880_v61, %v2779_v9 }
 0xfb9   :  { %2450 = vtanh.f32 %v1897_v18  ;;  %v2212_v21 = vmul.f32 -1.442695, %v1896_v62  ;;  %v2213_v5 = vmul.f32 -1.442695, %v1897_v18 }
 0xfbb   :  { %2452 = vpow2.f32 %v2212_v21 }
 0xfbc   :  { %v1849_v17 = vpop.f32.mrf.mxu2  ;;  %v1862_v33 = vpop.f32.mrf.mxu3 }
 0xfbf   :  { %v2451_v20 = vpop.eup %2450 }
 0xfc0   :  { %1939 = vrot.lane.b32.xlu0 %v2451_v20, %s2545_s21 }
 0xfc1   :  { %v2453_v4 = vpop.eup %2452 }
 0xfc2   :  { %v1904_v11 = vadd.f32 1.0, %v2453_v4 }
 0xfc4   :  { %2454 = vrcp.f32 %v1904_v11  ;;  %v1917_v55 = vand.u32 2147483648, %v1904_v11  ;;  %vm1911_vm2 = vweird.f32 %v1904_v11  ;;  %v1915_v36 = vand.u32 2147483647, %v1904_v11 }
 0xfc6   :  { %v1918_v22 = vor.u32 1.1754944e-38, %v1917_v55  ;;  %vm1916_vm4 = vcmp.eq.f32.partialorder %v1915_v36, 8.507059e+37 }
 0xfca   :  { %v2455_v23 = vpop.eup %2454 }
 0xfcb   :  { %v1907_v34 = vmul.f32 %v2455_v23, %v1904_v11  ;;  %vm1912_vm1 = vweird.f32 %v2455_v23 }
 0xfcc   :  { %vm1913_vm3 = vmor %vm1911_vm2, %vm1912_vm1 }
 0xfcd   :  { %v1908_v24 = vsub.f32 1.0, %v1907_v34 }
 0xfcf   :  { %v1909_v35 = vmul.f32 %v2455_v23, %v1908_v24 }
 0xfd1   :  { %v1910_v31 = vadd.f32 %v2455_v23, %v1909_v35 }
 0xfd3   :  { %v1914_v29 = vsel %vm1913_vm3, %v2455_v23, %v1910_v31 }
 0xfd4   :  { %v1919_v9 = vsel %vm1916_vm4, %v1918_v22, %v1914_v29 }
 0xfd5   :  { %v1937_v63 = vmul.f32 %v1919_v9, %v3116_v6 }
0x1032   :  { %v1940_v45 = vpop.permute.xlu0 %1939 }
0x1033   :  { %v1942_v28 = vmul.f32 %v1940_v45, %v1919_v9 }
0x1035   :  { %1944 = vrot.lane.b32.xlu1 %v1942_v28, %s2545_s21 }
0x10a7   :  { %v1945_v53 = vpop.permute.xlu1 %1944 }
0x10a8   :  { %v1947_v58 = vadd.f32 %v1945_v53, %v1937_v63 }
0x10aa   :  { %2456 = vtanh.f32 %v1947_v58 }
0x10ab   :  { %2458 = vpow2.f32 %v2213_v5 }
0x10b0   :  { %v2457_v49 = vpop.eup %2456 }
0x10b1   :  { %1950 = vrot.lane.b32.xlu2 %v2457_v49, %s2545_s21  ;;  %v2459_v51 = vpop.eup %2458 }
0x10b2   :  { %v1905_v7 = vadd.f32 1.0, %v2459_v51 }
0x10b4   :  { %2460 = vrcp.f32 %v1905_v7  ;;  %v1932_v60 = vand.u32 2147483648, %v1905_v7  ;;  %vm1926_vm6 = vweird.f32 %v1905_v7  ;;  %v1930_v30 = vand.u32 2147483647, %v1905_v7 }
0x10b6   :  { %v1933_v1 = vor.u32 1.1754944e-38, %v1932_v60  ;;  %vm1931_vm8 = vcmp.eq.f32.partialorder %v1930_v30, 8.507059e+37 }
0x10ba   :  { %v2461_v8 = vpop.eup %2460 }
0x10bb   :  { %v1922_v14 = vmul.f32 %v2461_v8, %v1905_v7  ;;  %vm1927_vm5 = vweird.f32 %v2461_v8 }
0x10bc   :  { %vm1928_vm7 = vmor %vm1926_vm6, %vm1927_vm5 }
0x10bd   :  { %v1923_v19 = vsub.f32 1.0, %v1922_v14 }
0x10bf   :  { %v1924_v6 = vmul.f32 %v2461_v8, %v1923_v19 }
0x10c1   :  { %v1925_v27 = vadd.f32 %v2461_v8, %v1924_v6 }
0x10c3   :  { %v1929_v59 = vsel %vm1928_vm7, %v2461_v8, %v1925_v27 }
0x10c4   :  { %v1934_v56 = vsel %vm1931_vm8, %v1933_v1, %v1929_v59 }
0x110b   :  { %v1951_v0 = vpop.permute.xlu2 %1950 }
0x110c   :  { %v1953_v2 = vmul.f32 %v1951_v0, %v1934_v56 }
0x110e   :  { %v1954_v16 = vpack.c.bf16 %v1953_v2, %v1953_v2 }
0x1110   :  { %2230 = vmatmul.msk.bf16.vlgmr.msra.gmra.mxu2 %vm184_vm9, %v1954_v16 }
0x1193   :  { %v2003_v41 = vpop.f32.mrf.mxu2 }
0x1194   :  { %v2004_v52 = vadd.f32 %v2269_v37, %v2003_v41 }
0x1196   :  { %2008 = vst.msk [vmem:[#allocation7] sm:$0x3] %vm2007_vm10, %v2004_v52 }
0x1197   :  { %2019 = dma.vmem_to_hbm [thread:$0]  %s2015_s10, 32, %s2017_s2, [#allocation4]  }
0x119b   :  { %v2005_v26 = vpop.f32.mrf.mxu2 }
0x119c   :  { %2538 = dma.done.wait [#allocation4], 32  }
0x119d   :  { %2539 = vsyncadd [#allocation4], 4294967264 }
0x119e   :  { %2024 = vsyncpa [#allocation3], 1 }
0x119f   :  { %2025 = vsyncpa [#allocation6], 1 }
0x11a0   :  { %2026 = vsyncpa [#allocation4], 1 }

</bundles_post_ra>
